<compile_context>
chip_gen: v5e
topology: v5e:2x2
jax: 0.10.0
libtpu: 0.0.40
codegen_flags: <defaults>
</compile_context>

<pallas_src>
import functools

import jax
import jax.numpy as jnp
import numpy as np
from jax import lax
from jax.experimental import pallas as pl
from jax.experimental.pallas import tpu as pltpu

THRESHOLD = 1.0 - 0.1  # matches self.threshold in the module
P_BOOK = 128           # lane width of the halting bookkeeping (one lane tile)


def _choose_block_batch(B, S, target_rows):
    """Fold batch elements into one grid step.

    Targets ~target_rows flattened rows while (a) keeping the block's
    second-minor dim 8-aligned (or full), and (b) keeping n_blocks >= 2 so the
    "parallel" batch-block axis can shard across v7x's two TensorCores and the
    pipeline has more than one step to overlap DMA with compute."""
    best = None
    for d in range(1, B + 1):
        if B % d:
            continue
        rows = d * S
        if rows > max(target_rows, S):
            continue
        if rows % 8 != 0 and rows != B * S:
            continue                    # block sublane dim must be 8-aligned or full
        if B >= 2 and B // d < 2:
            continue                    # keep both v7x TensorCores busy
        best = d
    if best is None:
        best = B                        # fallback: one full-batch block
    return best


def act_kernel(state_ref, time_ref, pos_ref, wfused_ref, bf_ref, bp_ref,
               prev_ref, stats_ref,
               state_scr, prev_scr, time_scr, halt_scr, rem_scr, nup_scr,
               *, max_hop, threshold, seq_len, proj_lanes):
    """One flattened (rows, H) block of bt = rows // seq_len batch elements.

    Inputs:  state (rows,H) f32, time (S,H) f32, pos (max_hop,1,H) f32,
             wfused (H, proj_lanes+H) bf16 = [wp replicated | wf],
             bf (1,H) f32, bp (1,) f32 in SMEM.
    Outputs: prev (rows,H) f32, stats (rows,2) f32 = [remainders | n_updates].
    Scratch: state/prev/time (rows,H) f32, halt/rem/nup (rows,128) f32."""
    rows, hidden = state_ref.shape
    bt = rows // seq_len

    # ---- per-grid-step init of the resident scratch accumulators ----
    state_scr[...] = state_ref[...]
    prev_scr[...] = jnp.zeros_like(prev_scr)
    halt_scr[...] = jnp.zeros_like(halt_scr)
    rem_scr[...] = jnp.zeros_like(rem_scr)
    nup_scr[...] = jnp.zeros_like(nup_scr)
    # Broadcast the (S, H) time encoding across the bt folded batch elements
    # once per grid step (hoisted out of the hop loop; a no-op when bt == 1).
    time_scr[...] = jnp.broadcast_to(
        time_ref[...][None, :, :], (bt, seq_len, hidden)).reshape(rows, hidden)

    bp = bp_ref[0]                      # scalar halting bias (SMEM)

    def hop(step, carry):
        st = state_scr[...] + time_scr[...] + pos_ref[step]      # (rows, H) f32
        # One fused bf16 MXU matmul per hop, f32 accumulation:
        #   lanes [:proj_lanes]  -> halting projection (lane-replicated)
        #   lanes [proj_lanes:]  -> transition Linear(H, H)
        fused = jnp.dot(st.astype(jnp.bfloat16), wfused_ref[...],
                        preferred_element_type=jnp.float32)      # (rows, proj_lanes+H)
        p = jax.nn.sigmoid(fused[:, :P_BOOK] + bp)               # (rows, 128) f32
        new_state = jnp.maximum(fused[:, proj_lanes:] + bf_ref[...], 0.0)

        # Halting bookkeeping: all f32, lane width 128 (not H).
        halt = halt_scr[...]
        rem = rem_scr[...]
        still = (halt < 1.0).astype(jnp.float32)
        gate = halt + p * still
        new_halted = (gate > threshold).astype(jnp.float32) * still
        still = (gate <= threshold).astype(jnp.float32) * still
        halt = halt + p * still
        rem = rem + new_halted * (1.0 - halt)
        halt = halt + new_halted * rem
        nup_scr[...] = nup_scr[...] + still + new_halted
        halt_scr[...] = halt
        rem_scr[...] = rem

        update_w = p * still + new_halted * rem                  # (rows, 128), lane-replicated
        # Single lane-broadcast back to H lanes for the weighted-state update.
        uw = jnp.broadcast_to(update_w[:, 0:1], (rows, hidden))
        state_scr[...] = new_state
        prev_scr[...] = new_state * uw + prev_scr[...] * (1.0 - uw)
        return carry

    lax.fori_loop(0, max_hop, hop, 0, unroll=max_hop <= 8)

    prev_ref[...] = prev_scr[...]
    # remainders / n_updates are lane-replicated; store lane 0 of each, packed
    # into one (rows, 2) output.  TODO(synk): switch to a lane-dense (2, rows)
    # slab if the masked sub-lane stores ever show up in a profile.
    stats_ref[:, 0:1] = rem_scr[:, 0:1]
    stats_ref[:, 1:2] = nup_scr[:, 0:1]


def act_forward(state, time_enc, pos_enc, wp, bp, wf, bf, *, max_hop,
                threshold=THRESHOLD):
    """state: (B,S,H) f32.  time_enc: (1,>=S,H).  pos_enc: (1,>=max_hop,H).
       wp: (1,H) halting-proj weight, bp: (1,) its bias, wf: (H,H), bf: (H,)."""
    B, S, H = state.shape
    target_rows = 512 if H < 1024 else 256     # smaller row tiles at large H (v7x VMEM)
    bt = _choose_block_batch(B, S, target_rows)
    rows = bt * S
    n_blocks = B // bt

    # Replicate the halting column so the fused matmul output width stays a
    # multiple of the 256-wide v6e/v7x MXU edge whenever H is 256-aligned.
    proj_lanes = 256 if H % 256 == 0 else P_BOOK

    # Host-side layout glue (all static):
    state_flat = state.reshape(B * S, H).astype(jnp.float32)
    time2 = time_enc[0, :S, :].astype(jnp.float32)                       # (S, H)
    pos3 = pos_enc[0, :max_hop, :].astype(jnp.float32).reshape(max_hop, 1, H)
    wp_rep = jnp.tile(wp.reshape(H, 1).astype(jnp.float32), (1, proj_lanes))
    wfused = jnp.concatenate([wp_rep, wf.astype(jnp.float32)],
                             axis=1).astype(jnp.bfloat16)                # (H, proj_lanes+H)
    bf2 = bf.reshape(1, H).astype(jnp.float32)
    bp1 = bp.reshape(1).astype(jnp.float32)

    kernel = functools.partial(act_kernel, max_hop=max_hop,
                               threshold=float(threshold), seq_len=S,
                               proj_lanes=proj_lanes)

    out_shapes = (
        jax.ShapeDtypeStruct((B * S, H), jnp.float32),   # previous_state (flat)
        jax.ShapeDtypeStruct((B * S, 2), jnp.float32),   # [remainders, n_updates]
    )

    grid_spec = pltpu.PrefetchScalarGridSpec(
        num_scalar_prefetch=0,
        grid=(n_blocks,),
        in_specs=[
            pl.BlockSpec((rows, H), lambda b: (b, 0)),                # state
            pl.BlockSpec((S, H), lambda b: (0, 0)),                   # time_enc
            pl.BlockSpec((max_hop, 1, H), lambda b: (0, 0, 0)),       # pos_enc
            pl.BlockSpec((H, proj_lanes + H), lambda b: (0, 0)),      # fused weight (bf16)
            pl.BlockSpec((1, H), lambda b: (0, 0)),                   # bf
            pl.BlockSpec(memory_space=pltpu.MemorySpace.SMEM),        # bp (scalar)
        ],
        out_specs=[
            pl.BlockSpec((rows, H), lambda b: (b, 0)),
            pl.BlockSpec((rows, 2), lambda b: (b, 0)),
        ],
        scratch_shapes=[
            pltpu.VMEM((rows, H), jnp.float32),       # state
            pltpu.VMEM((rows, H), jnp.float32),       # previous_state accumulator
            pltpu.VMEM((rows, H), jnp.float32),       # broadcast time tile
            pltpu.VMEM((rows, P_BOOK), jnp.float32),  # halting probability
            pltpu.VMEM((rows, P_BOOK), jnp.float32),  # remainders
            pltpu.VMEM((rows, P_BOOK), jnp.float32),  # n_updates
        ],
    )

    prev_flat, stats = pl.pallas_call(
        kernel,
        out_shape=out_shapes,
        grid_spec=grid_spec,
        compiler_params=pltpu.CompilerParams(
            # Parallel batch-block axis: n_blocks >= 2, so it shards across the
            # 2 TensorCores on v7x; no-op on single-TC v5e/v6e.
            dimension_semantics=("parallel",),
            vmem_limit_bytes=32 * 1024 * 1024),
    )(state_flat, time2, pos3, wfused, bf2, bp1)

    prev = prev_flat.reshape(B, S, H)
    rem = stats[:, 0].reshape(B, S)
    nup = stats[:, 1].reshape(B, S)
    # Match the PyTorch return signature: previous_state, (remainders, n_updates)
    return prev, (rem, nup)


def act_reference(state, time_enc, pos_enc, wp, bp, wf, bf, *, max_hop,
                  threshold=THRESHOLD):
    """Pure-JAX reference mirroring the PyTorch forward (decoding=False) with
    the same matmul numerics as the kernel (bf16 operands, f32 accumulation);
    all mask/halting arithmetic stays f32 exactly like the kernel.

    Also returns the minimum |gate - threshold| margin over all live halting
    comparisons, so the test can verify the hard > / <= decisions cannot flip
    from tiny kernel-vs-XLA rounding differences."""
    B, S, H = state.shape
    halt = jnp.zeros((B, S), jnp.float32)
    rem = jnp.zeros((B, S), jnp.float32)
    nup = jnp.zeros((B, S), jnp.float32)
    prev = jnp.zeros_like(state)
    wp_b = wp[0].astype(jnp.bfloat16)
    wf_b = wf.astype(jnp.bfloat16)
    min_margin = jnp.float32(jnp.inf)
    for step in range(max_hop):
        state = state + time_enc[:, :S, :] + pos_enc[:, step, :][:, None, :]
        sb = state.astype(jnp.bfloat16)
        p = jax.nn.sigmoid(
            jnp.einsum("bsh,h->bs", sb, wp_b,
                       preferred_element_type=jnp.float32) + bp[0])
        still = (halt < 1.0).astype(jnp.float32)
        gate = halt + p * still
        min_margin = jnp.minimum(
            min_margin,
            jnp.min(jnp.where(still > 0, jnp.abs(gate - threshold), jnp.inf)))
        new_halted = (gate > threshold).astype(jnp.float32) * still
        still = (gate <= threshold).astype(jnp.float32) * still
        halt = halt + p * still
        rem = rem + new_halted * (1.0 - halt)
        halt = halt + new_halted * rem
        nup = nup + still + new_halted
        uw = p * still + new_halted * rem
        state = jnp.maximum(
            jnp.einsum("bsh,hk->bsk", sb, wf_b,
                       preferred_element_type=jnp.float32) + bf[None, None, :],
            0.0)
        prev = state * uw[..., None] + prev * (1.0 - uw[..., None])
    return prev, rem, nup, min_margin


if __name__ == "__main__":
    B, S, H, MAX_HOP = 2, 8, 32, 4

    key = jax.random.PRNGKey(0)
    ks = jax.random.split(key, 6)
    state = jax.random.normal(ks[0], (B, S, H), jnp.float32)
    time_enc = 0.1 * jax.random.normal(ks[1], (1, S, H), jnp.float32)
    pos_enc = 0.1 * jax.random.normal(ks[2], (1, MAX_HOP, H), jnp.float32)

    # Parameters (deterministic synthetic init).  The halting-projection weight
    # is scaled so every halting decision sits a comfortable margin away from
    # the 0.9 threshold; the margin check below guarantees the hard > / <=
    # comparisons cannot flip from bf16/MXU rounding differences.
    wp = 0.05 * jax.random.normal(ks[3], (1, H), jnp.float32)   # self.p weight
    bp = jnp.ones((1,), jnp.float32)                            # p.bias.fill_(1)
    wf = jax.random.normal(ks[4], (H, H), jnp.float32) / jnp.sqrt(H)  # fn weight
    bf = 0.01 * jax.random.normal(ks[5], (H,), jnp.float32)           # fn bias

    prev, (rem, nup) = act_forward(state, time_enc, pos_enc, wp, bp, wf, bf,
                                   max_hop=MAX_HOP)
    jax.block_until_ready((prev, rem, nup))

    prev_r, rem_r, nup_r, min_margin = act_reference(
        state, time_enc, pos_enc, wp, bp, wf, bf, max_hop=MAX_HOP)

    # Threshold-margin check: halting decisions are identical in kernel and
    # reference (residual rounding deltas are orders of magnitude smaller).
    assert float(min_margin) > 0.01, (
        f"halting decisions too close to threshold: margin={float(min_margin)}")

    np.testing.assert_allclose(np.asarray(prev), np.asarray(prev_r),
                               rtol=5e-3, atol=5e-3)
    np.testing.assert_allclose(np.asarray(rem), np.asarray(rem_r),
                               rtol=5e-3, atol=5e-3)
    np.testing.assert_allclose(np.asarray(nup), np.asarray(nup_r),
                               rtol=5e-3, atol=5e-3)

    print("KERNEL_OK")
</pallas_src>

<mosaic_0001>
module attributes {stable_mosaic.version = 11 : i64} {
  func.func @act_kernel(%arg0: i32, %arg1: memref<8x32xf32, #tpu.memory_space<vmem>>, %arg2: memref<8x32xf32, #tpu.memory_space<vmem>>, %arg3: memref<4x1x32xf32, #tpu.memory_space<vmem>>, %arg4: memref<32x160xbf16, #tpu.memory_space<vmem>>, %arg5: memref<1x32xf32, #tpu.memory_space<vmem>>, %arg6: memref<1xf32, #tpu.memory_space<smem>>, %arg7: memref<8x32xf32, #tpu.memory_space<vmem>>, %arg8: memref<8x2xf32, #tpu.memory_space<vmem>>, %arg9: memref<8x32xf32, #tpu.memory_space<vmem>>, %arg10: memref<8x32xf32, #tpu.memory_space<vmem>>, %arg11: memref<8x32xf32, #tpu.memory_space<vmem>>, %arg12: memref<8x128xf32, #tpu.memory_space<vmem>>, %arg13: memref<8x128xf32, #tpu.memory_space<vmem>>, %arg14: memref<8x128xf32, #tpu.memory_space<vmem>>) attributes {dimension_semantics = [#tpu.dimension_semantics<parallel>], iteration_bounds = array<i64: 2>, scalar_prefetch = 0 : i64, scratch_operands = 6 : i64, tpu.core_type = #tpu.core_type<tc>, window_params = [{transform_indices = @transform_0, window_bounds = array<i64: 8, 32>}, {pipeline_mode = #tpu.pipeline_mode<synchronous>, transform_indices = @transform_1, window_bounds = array<i64: 8, 32>}, {pipeline_mode = #tpu.pipeline_mode<synchronous>, transform_indices = @transform_2, window_bounds = array<i64: 4, 1, 32>}, {pipeline_mode = #tpu.pipeline_mode<synchronous>, transform_indices = @transform_3, window_bounds = array<i64: 32, 160>}, {pipeline_mode = #tpu.pipeline_mode<synchronous>, transform_indices = @transform_4, window_bounds = array<i64: 1, 32>}, {transform_indices = @transform_5, window_bounds = array<i64: 1>}, {transform_indices = @transform_6, window_bounds = array<i64: 8, 32>}, {transform_indices = @transform_7, window_bounds = array<i64: 8, 2>}]} {
    %c0 = arith.constant 0 : index
    %c0_0 = arith.constant 0 : index
    %0 = vector.load %arg1[%c0, %c0_0] : memref<8x32xf32, #tpu.memory_space<vmem>>, vector<8x32xf32>
    %c0_1 = arith.constant 0 : index
    %c0_2 = arith.constant 0 : index
    %1 = vector.load %arg9[%c0_1, %c0_2] : memref<8x32xf32, #tpu.memory_space<vmem>>, vector<8x32xf32>
    tpu.vector_store %arg9[%c0_1, %c0_2], %0 {strides = array<i32>} : memref<8x32xf32, #tpu.memory_space<vmem>>, vector<8x32xf32>,
    %cst = arith.constant 0.000000e+00 : f32
    %2 = vector.broadcast %cst : f32 to vector<8x32xf32>
    %c0_3 = arith.constant 0 : index
    %c0_4 = arith.constant 0 : index
    %3 = vector.load %arg10[%c0_3, %c0_4] : memref<8x32xf32, #tpu.memory_space<vmem>>, vector<8x32xf32>
    tpu.vector_store %arg10[%c0_3, %c0_4], %2 {strides = array<i32>} : memref<8x32xf32, #tpu.memory_space<vmem>>, vector<8x32xf32>,
    %cst_5 = arith.constant 0.000000e+00 : f32
    %4 = vector.broadcast %cst_5 : f32 to vector<8x128xf32>
    %c0_6 = arith.constant 0 : index
    %c0_7 = arith.constant 0 : index
    %5 = vector.load %arg12[%c0_6, %c0_7] : memref<8x128xf32, #tpu.memory_space<vmem>>, vector<8x128xf32>
    tpu.vector_store %arg12[%c0_6, %c0_7], %4 {strides = array<i32>} : memref<8x128xf32, #tpu.memory_space<vmem>>, vector<8x128xf32>,
    %cst_8 = arith.constant 0.000000e+00 : f32
    %6 = vector.broadcast %cst_8 : f32 to vector<8x128xf32>
    %c0_9 = arith.constant 0 : index
    %c0_10 = arith.constant 0 : index
    %7 = vector.load %arg13[%c0_9, %c0_10] : memref<8x128xf32, #tpu.memory_space<vmem>>, vector<8x128xf32>
    tpu.vector_store %arg13[%c0_9, %c0_10], %6 {strides = array<i32>} : memref<8x128xf32, #tpu.memory_space<vmem>>, vector<8x128xf32>,
    %cst_11 = arith.constant 0.000000e+00 : f32
    %8 = vector.broadcast %cst_11 : f32 to vector<8x128xf32>
    %c0_12 = arith.constant 0 : index
    %c0_13 = arith.constant 0 : index
    %9 = vector.load %arg14[%c0_12, %c0_13] : memref<8x128xf32, #tpu.memory_space<vmem>>, vector<8x128xf32>
    tpu.vector_store %arg14[%c0_12, %c0_13], %8 {strides = array<i32>} : memref<8x128xf32, #tpu.memory_space<vmem>>, vector<8x128xf32>,
    %c0_14 = arith.constant 0 : index
    %c0_15 = arith.constant 0 : index
    %10 = vector.load %arg2[%c0_14, %c0_15] : memref<8x32xf32, #tpu.memory_space<vmem>>, vector<8x32xf32>
    %11 = vector.shape_cast %10 : vector<8x32xf32> to vector<1x8x32xf32>
    %12 = vector.shape_cast %11 : vector<1x8x32xf32> to vector<8x32xf32>
    %c0_16 = arith.constant 0 : index
    %c0_17 = arith.constant 0 : index
    %13 = vector.load %arg11[%c0_16, %c0_17] : memref<8x32xf32, #tpu.memory_space<vmem>>, vector<8x32xf32>
    tpu.vector_store %arg11[%c0_16, %c0_17], %12 {strides = array<i32>} : memref<8x32xf32, #tpu.memory_space<vmem>>, vector<8x32xf32>,
    %c0_18 = arith.constant 0 : index
    %14 = memref.load %arg6[%c0_18] : memref<1xf32, #tpu.memory_space<smem>>
    %c0_i32 = arith.constant 0 : i32
    %c0_19 = arith.constant 0 : index
    %c0_20 = arith.constant 0 : index
    %15 = vector.load %arg9[%c0_19, %c0_20] : memref<8x32xf32, #tpu.memory_space<vmem>>, vector<8x32xf32>
    %c0_21 = arith.constant 0 : index
    %c0_22 = arith.constant 0 : index
    %16 = vector.load %arg11[%c0_21, %c0_22] : memref<8x32xf32, #tpu.memory_space<vmem>>, vector<8x32xf32>
    %17 = arith.addf %15, %16 : vector<8x32xf32>
    %18 = arith.index_cast %c0_i32 : i32 to index
    %c0_23 = arith.constant 0 : index
    %c0_24 = arith.constant 0 : index
    %19 = vector.load %arg3[%18, %c0_23, %c0_24] : memref<4x1x32xf32, #tpu.memory_space<vmem>>, vector<1x1x32xf32>
    %20 = vector.shape_cast %19 : vector<1x1x32xf32> to vector<1x32xf32>
    %21 = vector.broadcast %20 : vector<1x32xf32> to vector<8x32xf32>
    %22 = arith.addf %17, %21 : vector<8x32xf32>
    %23 = arith.truncf %22 : vector<8x32xf32> to vector<8x32xbf16>
    %c0_25 = arith.constant 0 : index
    %c0_26 = arith.constant 0 : index
    %24 = vector.load %arg4[%c0_25, %c0_26] : memref<32x160xbf16, #tpu.memory_space<vmem>>, vector<32x160xbf16>
    %cst_27 = arith.constant dense<0.000000e+00> : vector<8x160xf32>
    %25 = tpu.matmul %23, %24, %cst_27 {dimension_numbers = #tpu.dot_dimension_numbers<[1], [0], [0], [1], [0, 0, 1, 1], [], []>} : vector<8x32xbf16>, vector<32x160xbf16>, vector<8x160xf32> -> vector<8x160xf32>
    %26 = vector.extract_strided_slice %25 {offsets = [0, 0], sizes = [8, 128], strides = [1, 1]} : vector<8x160xf32> to vector<8x128xf32>
    %27 = vector.broadcast %14 : f32 to vector<8x128xf32>
    %28 = arith.addf %26, %27 : vector<8x128xf32>
    %29 = arith.negf %28 : vector<8x128xf32>
    %30 = math.exp %29 : vector<8x128xf32>
    %cst_28 = arith.constant 1.000000e+00 : f32
    %31 = vector.broadcast %cst_28 : f32 to vector<8x128xf32>
    %32 = arith.addf %31, %30 : vector<8x128xf32>
    %33 = arith.divf %31, %32 : vector<8x128xf32>
    %34 = vector.extract_strided_slice %25 {offsets = [0, 128], sizes = [8, 32], strides = [1, 1]} : vector<8x160xf32> to vector<8x32xf32>
    %c0_29 = arith.constant 0 : index
    %c0_30 = arith.constant 0 : index
    %35 = vector.load %arg5[%c0_29, %c0_30] : memref<1x32xf32, #tpu.memory_space<vmem>>, vector<1x32xf32>
    %36 = vector.broadcast %35 : vector<1x32xf32> to vector<8x32xf32>
    %37 = arith.addf %34, %36 : vector<8x32xf32>
    %cst_31 = arith.constant 0.000000e+00 : f32
    %38 = vector.broadcast %cst_31 : f32 to vector<8x32xf32>
    %39 = arith.maximumf %37, %38 : vector<8x32xf32>
    %c0_32 = arith.constant 0 : index
    %c0_33 = arith.constant 0 : index
    %40 = vector.load %arg12[%c0_32, %c0_33] : memref<8x128xf32, #tpu.memory_space<vmem>>, vector<8x128xf32>
    %c0_34 = arith.constant 0 : index
    %c0_35 = arith.constant 0 : index
    %41 = vector.load %arg13[%c0_34, %c0_35] : memref<8x128xf32, #tpu.memory_space<vmem>>, vector<8x128xf32>
    %cst_36 = arith.constant 1.000000e+00 : f32
    %42 = vector.broadcast %cst_36 : f32 to vector<8x128xf32>
    %43 = arith.cmpf olt, %40, %42 : vector<8x128xf32>
    %44 = arith.extui %43 : vector<8x128xi1> to vector<8x128xi32>
    %45 = arith.sitofp %44 : vector<8x128xi32> to vector<8x128xf32>
    %46 = arith.mulf %33, %45 : vector<8x128xf32>
    %47 = arith.addf %40, %46 : vector<8x128xf32>
    %cst_37 = arith.constant 0.899999976 : f32
    %48 = vector.broadcast %cst_37 : f32 to vector<8x128xf32>
    %49 = arith.cmpf ogt, %47, %48 : vector<8x128xf32>
    %50 = arith.extui %49 : vector<8x128xi1> to vector<8x128xi32>
    %51 = arith.sitofp %50 : vector<8x128xi32> to vector<8x128xf32>
    %52 = arith.mulf %51, %45 : vector<8x128xf32>
    %cst_38 = arith.constant 0.899999976 : f32
    %53 = vector.broadcast %cst_38 : f32 to vector<8x128xf32>
    %54 = arith.cmpf ole, %47, %53 : vector<8x128xf32>
    %55 = arith.extui %54 : vector<8x128xi1> to vector<8x128xi32>
    %56 = arith.sitofp %55 : vector<8x128xi32> to vector<8x128xf32>
    %57 = arith.mulf %56, %45 : vector<8x128xf32>
    %58 = arith.mulf %33, %57 : vector<8x128xf32>
    %59 = arith.addf %40, %58 : vector<8x128xf32>
    %cst_39 = arith.constant 1.000000e+00 : f32
    %60 = vector.broadcast %cst_39 : f32 to vector<8x128xf32>
    %61 = arith.subf %60, %59 : vector<8x128xf32>
    %62 = arith.mulf %52, %61 : vector<8x128xf32>
    %63 = arith.addf %41, %62 : vector<8x128xf32>
    %64 = arith.mulf %52, %63 : vector<8x128xf32>
    %65 = arith.addf %59, %64 : vector<8x128xf32>
    %c0_40 = arith.constant 0 : index
    %c0_41 = arith.constant 0 : index
    %66 = vector.load %arg14[%c0_40, %c0_41] : memref<8x128xf32, #tpu.memory_space<vmem>>, vector<8x128xf32>
    %67 = arith.addf %66, %57 : vector<8x128xf32>
    %68 = arith.addf %67, %52 : vector<8x128xf32>
    %c0_42 = arith.constant 0 : index
    %c0_43 = arith.constant 0 : index
    %69 = vector.load %arg14[%c0_42, %c0_43] : memref<8x128xf32, #tpu.memory_space<vmem>>, vector<8x128xf32>
    tpu.vector_store %arg14[%c0_42, %c0_43], %68 {strides = array<i32>} : memref<8x128xf32, #tpu.memory_space<vmem>>, vector<8x128xf32>,
    %c0_44 = arith.constant 0 : index
    %c0_45 = arith.constant 0 : index
    %70 = vector.load %arg12[%c0_44, %c0_45] : memref<8x128xf32, #tpu.memory_space<vmem>>, vector<8x128xf32>
    tpu.vector_store %arg12[%c0_44, %c0_45], %65 {strides = array<i32>} : memref<8x128xf32, #tpu.memory_space<vmem>>, vector<8x128xf32>,
    %c0_46 = arith.constant 0 : index
    %c0_47 = arith.constant 0 : index
    %71 = vector.load %arg13[%c0_46, %c0_47] : memref<8x128xf32, #tpu.memory_space<vmem>>, vector<8x128xf32>
    tpu.vector_store %arg13[%c0_46, %c0_47], %63 {strides = array<i32>} : memref<8x128xf32, #tpu.memory_space<vmem>>, vector<8x128xf32>,
    %72 = arith.mulf %33, %57 : vector<8x128xf32>
    %73 = arith.mulf %52, %63 : vector<8x128xf32>
    %74 = arith.addf %72, %73 : vector<8x128xf32>
    %75 = vector.extract_strided_slice %74 {offsets = [0, 0], sizes = [8, 1], strides = [1, 1]} : vector<8x128xf32> to vector<8x1xf32>
    %76 = vector.shape_cast %75 : vector<8x1xf32> to vector<8x1xf32>
    %77 = vector.broadcast %76 : vector<8x1xf32> to vector<8x32xf32>
    %c0_48 = arith.constant 0 : index
    %c0_49 = arith.constant 0 : index
    %78 = vector.load %arg9[%c0_48, %c0_49] : memref<8x32xf32, #tpu.memory_space<vmem>>, vector<8x32xf32>
    tpu.vector_store %arg9[%c0_48, %c0_49], %39 {strides = array<i32>} : memref<8x32xf32, #tpu.memory_space<vmem>>, vector<8x32xf32>,
    %79 = arith.mulf %39, %77 : vector<8x32xf32>
    %c0_50 = arith.constant 0 : index
    %c0_51 = arith.constant 0 : index
    %80 = vector.load %arg10[%c0_50, %c0_51] : memref<8x32xf32, #tpu.memory_space<vmem>>, vector<8x32xf32>
    %cst_52 = arith.constant 1.000000e+00 : f32
    %81 = vector.broadcast %cst_52 : f32 to vector<8x32xf32>
    %82 = arith.subf %81, %77 : vector<8x32xf32>
    %83 = arith.mulf %80, %82 : vector<8x32xf32>
    %84 = arith.addf %79, %83 : vector<8x32xf32>
    %c0_53 = arith.constant 0 : index
    %c0_54 = arith.constant 0 : index
    %85 = vector.load %arg10[%c0_53, %c0_54] : memref<8x32xf32, #tpu.memory_space<vmem>>, vector<8x32xf32>
    tpu.vector_store %arg10[%c0_53, %c0_54], %84 {strides = array<i32>} : memref<8x32xf32, #tpu.memory_space<vmem>>, vector<8x32xf32>,
    %c1_i32 = arith.constant 1 : i32
    %c0_55 = arith.constant 0 : index
    %c0_56 = arith.constant 0 : index
    %86 = vector.load %arg9[%c0_55, %c0_56] : memref<8x32xf32, #tpu.memory_space<vmem>>, vector<8x32xf32>
    %c0_57 = arith.constant 0 : index
    %c0_58 = arith.constant 0 : index
    %87 = vector.load %arg11[%c0_57, %c0_58] : memref<8x32xf32, #tpu.memory_space<vmem>>, vector<8x32xf32>
    %88 = arith.addf %86, %87 : vector<8x32xf32>
    %89 = arith.index_cast %c1_i32 : i32 to index
    %c0_59 = arith.constant 0 : index
    %c0_60 = arith.constant 0 : index
    %90 = vector.load %arg3[%89, %c0_59, %c0_60] : memref<4x1x32xf32, #tpu.memory_space<vmem>>, vector<1x1x32xf32>
    %91 = vector.shape_cast %90 : vector<1x1x32xf32> to vector<1x32xf32>
    %92 = vector.broadcast %91 : vector<1x32xf32> to vector<8x32xf32>
    %93 = arith.addf %88, %92 : vector<8x32xf32>
    %94 = arith.truncf %93 : vector<8x32xf32> to vector<8x32xbf16>
    %c0_61 = arith.constant 0 : index
    %c0_62 = arith.constant 0 : index
    %95 = vector.load %arg4[%c0_61, %c0_62] : memref<32x160xbf16, #tpu.memory_space<vmem>>, vector<32x160xbf16>
    %cst_63 = arith.constant dense<0.000000e+00> : vector<8x160xf32>
    %96 = tpu.matmul %94, %95, %cst_63 {dimension_numbers = #tpu.dot_dimension_numbers<[1], [0], [0], [1], [0, 0, 1, 1], [], []>} : vector<8x32xbf16>, vector<32x160xbf16>, vector<8x160xf32> -> vector<8x160xf32>
    %97 = vector.extract_strided_slice %96 {offsets = [0, 0], sizes = [8, 128], strides = [1, 1]} : vector<8x160xf32> to vector<8x128xf32>
    %98 = vector.broadcast %14 : f32 to vector<8x128xf32>
    %99 = arith.addf %97, %98 : vector<8x128xf32>
    %100 = arith.negf %99 : vector<8x128xf32>
    %101 = math.exp %100 : vector<8x128xf32>
    %cst_64 = arith.constant 1.000000e+00 : f32
    %102 = vector.broadcast %cst_64 : f32 to vector<8x128xf32>
    %103 = arith.addf %102, %101 : vector<8x128xf32>
    %104 = arith.divf %102, %103 : vector<8x128xf32>
    %105 = vector.extract_strided_slice %96 {offsets = [0, 128], sizes = [8, 32], strides = [1, 1]} : vector<8x160xf32> to vector<8x32xf32>
    %c0_65 = arith.constant 0 : index
    %c0_66 = arith.constant 0 : index
    %106 = vector.load %arg5[%c0_65, %c0_66] : memref<1x32xf32, #tpu.memory_space<vmem>>, vector<1x32xf32>
    %107 = vector.broadcast %106 : vector<1x32xf32> to vector<8x32xf32>
    %108 = arith.addf %105, %107 : vector<8x32xf32>
    %cst_67 = arith.constant 0.000000e+00 : f32
    %109 = vector.broadcast %cst_67 : f32 to vector<8x32xf32>
    %110 = arith.maximumf %108, %109 : vector<8x32xf32>
    %c0_68 = arith.constant 0 : index
    %c0_69 = arith.constant 0 : index
    %111 = vector.load %arg12[%c0_68, %c0_69] : memref<8x128xf32, #tpu.memory_space<vmem>>, vector<8x128xf32>
    %c0_70 = arith.constant 0 : index
    %c0_71 = arith.constant 0 : index
    %112 = vector.load %arg13[%c0_70, %c0_71] : memref<8x128xf32, #tpu.memory_space<vmem>>, vector<8x128xf32>
    %cst_72 = arith.constant 1.000000e+00 : f32
    %113 = vector.broadcast %cst_72 : f32 to vector<8x128xf32>
    %114 = arith.cmpf olt, %111, %113 : vector<8x128xf32>
    %115 = arith.extui %114 : vector<8x128xi1> to vector<8x128xi32>
    %116 = arith.sitofp %115 : vector<8x128xi32> to vector<8x128xf32>
    %117 = arith.mulf %104, %116 : vector<8x128xf32>
    %118 = arith.addf %111, %117 : vector<8x128xf32>
    %cst_73 = arith.constant 0.899999976 : f32
    %119 = vector.broadcast %cst_73 : f32 to vector<8x128xf32>
    %120 = arith.cmpf ogt, %118, %119 : vector<8x128xf32>
    %121 = arith.extui %120 : vector<8x128xi1> to vector<8x128xi32>
    %122 = arith.sitofp %121 : vector<8x128xi32> to vector<8x128xf32>
    %123 = arith.mulf %122, %116 : vector<8x128xf32>
    %cst_74 = arith.constant 0.899999976 : f32
    %124 = vector.broadcast %cst_74 : f32 to vector<8x128xf32>
    %125 = arith.cmpf ole, %118, %124 : vector<8x128xf32>
    %126 = arith.extui %125 : vector<8x128xi1> to vector<8x128xi32>
    %127 = arith.sitofp %126 : vector<8x128xi32> to vector<8x128xf32>
    %128 = arith.mulf %127, %116 : vector<8x128xf32>
    %129 = arith.mulf %104, %128 : vector<8x128xf32>
    %130 = arith.addf %111, %129 : vector<8x128xf32>
    %cst_75 = arith.constant 1.000000e+00 : f32
    %131 = vector.broadcast %cst_75 : f32 to vector<8x128xf32>
    %132 = arith.subf %131, %130 : vector<8x128xf32>
    %133 = arith.mulf %123, %132 : vector<8x128xf32>
    %134 = arith.addf %112, %133 : vector<8x128xf32>
    %135 = arith.mulf %123, %134 : vector<8x128xf32>
    %136 = arith.addf %130, %135 : vector<8x128xf32>
    %c0_76 = arith.constant 0 : index
    %c0_77 = arith.constant 0 : index
    %137 = vector.load %arg14[%c0_76, %c0_77] : memref<8x128xf32, #tpu.memory_space<vmem>>, vector<8x128xf32>
    %138 = arith.addf %137, %128 : vector<8x128xf32>
    %139 = arith.addf %138, %123 : vector<8x128xf32>
    %c0_78 = arith.constant 0 : index
    %c0_79 = arith.constant 0 : index
    %140 = vector.load %arg14[%c0_78, %c0_79] : memref<8x128xf32, #tpu.memory_space<vmem>>, vector<8x128xf32>
    tpu.vector_store %arg14[%c0_78, %c0_79], %139 {strides = array<i32>} : memref<8x128xf32, #tpu.memory_space<vmem>>, vector<8x128xf32>,
    %c0_80 = arith.constant 0 : index
    %c0_81 = arith.constant 0 : index
    %141 = vector.load %arg12[%c0_80, %c0_81] : memref<8x128xf32, #tpu.memory_space<vmem>>, vector<8x128xf32>
    tpu.vector_store %arg12[%c0_80, %c0_81], %136 {strides = array<i32>} : memref<8x128xf32, #tpu.memory_space<vmem>>, vector<8x128xf32>,
    %c0_82 = arith.constant 0 : index
    %c0_83 = arith.constant 0 : index
    %142 = vector.load %arg13[%c0_82, %c0_83] : memref<8x128xf32, #tpu.memory_space<vmem>>, vector<8x128xf32>
    tpu.vector_store %arg13[%c0_82, %c0_83], %134 {strides = array<i32>} : memref<8x128xf32, #tpu.memory_space<vmem>>, vector<8x128xf32>,
    %143 = arith.mulf %104, %128 : vector<8x128xf32>
    %144 = arith.mulf %123, %134 : vector<8x128xf32>
    %145 = arith.addf %143, %144 : vector<8x128xf32>
    %146 = vector.extract_strided_slice %145 {offsets = [0, 0], sizes = [8, 1], strides = [1, 1]} : vector<8x128xf32> to vector<8x1xf32>
    %147 = vector.shape_cast %146 : vector<8x1xf32> to vector<8x1xf32>
    %148 = vector.broadcast %147 : vector<8x1xf32> to vector<8x32xf32>
    %c0_84 = arith.constant 0 : index
    %c0_85 = arith.constant 0 : index
    %149 = vector.load %arg9[%c0_84, %c0_85] : memref<8x32xf32, #tpu.memory_space<vmem>>, vector<8x32xf32>
    tpu.vector_store %arg9[%c0_84, %c0_85], %110 {strides = array<i32>} : memref<8x32xf32, #tpu.memory_space<vmem>>, vector<8x32xf32>,
    %150 = arith.mulf %110, %148 : vector<8x32xf32>
    %c0_86 = arith.constant 0 : index
    %c0_87 = arith.constant 0 : index
    %151 = vector.load %arg10[%c0_86, %c0_87] : memref<8x32xf32, #tpu.memory_space<vmem>>, vector<8x32xf32>
    %cst_88 = arith.constant 1.000000e+00 : f32
    %152 = vector.broadcast %cst_88 : f32 to vector<8x32xf32>
    %153 = arith.subf %152, %148 : vector<8x32xf32>
    %154 = arith.mulf %151, %153 : vector<8x32xf32>
    %155 = arith.addf %150, %154 : vector<8x32xf32>
    %c0_89 = arith.constant 0 : index
    %c0_90 = arith.constant 0 : index
    %156 = vector.load %arg10[%c0_89, %c0_90] : memref<8x32xf32, #tpu.memory_space<vmem>>, vector<8x32xf32>
    tpu.vector_store %arg10[%c0_89, %c0_90], %155 {strides = array<i32>} : memref<8x32xf32, #tpu.memory_space<vmem>>, vector<8x32xf32>,
    %c2_i32 = arith.constant 2 : i32
    %c0_91 = arith.constant 0 : index
    %c0_92 = arith.constant 0 : index
    %157 = vector.load %arg9[%c0_91, %c0_92] : memref<8x32xf32, #tpu.memory_space<vmem>>, vector<8x32xf32>
    %c0_93 = arith.constant 0 : index
    %c0_94 = arith.constant 0 : index
    %158 = vector.load %arg11[%c0_93, %c0_94] : memref<8x32xf32, #tpu.memory_space<vmem>>, vector<8x32xf32>
    %159 = arith.addf %157, %158 : vector<8x32xf32>
    %160 = arith.index_cast %c2_i32 : i32 to index
    %c0_95 = arith.constant 0 : index
    %c0_96 = arith.constant 0 : index
    %161 = vector.load %arg3[%160, %c0_95, %c0_96] : memref<4x1x32xf32, #tpu.memory_space<vmem>>, vector<1x1x32xf32>
    %162 = vector.shape_cast %161 : vector<1x1x32xf32> to vector<1x32xf32>
    %163 = vector.broadcast %162 : vector<1x32xf32> to vector<8x32xf32>
    %164 = arith.addf %159, %163 : vector<8x32xf32>
    %165 = arith.truncf %164 : vector<8x32xf32> to vector<8x32xbf16>
    %c0_97 = arith.constant 0 : index
    %c0_98 = arith.constant 0 : index
    %166 = vector.load %arg4[%c0_97, %c0_98] : memref<32x160xbf16, #tpu.memory_space<vmem>>, vector<32x160xbf16>
    %cst_99 = arith.constant dense<0.000000e+00> : vector<8x160xf32>
    %167 = tpu.matmul %165, %166, %cst_99 {dimension_numbers = #tpu.dot_dimension_numbers<[1], [0], [0], [1], [0, 0, 1, 1], [], []>} : vector<8x32xbf16>, vector<32x160xbf16>, vector<8x160xf32> -> vector<8x160xf32>
    %168 = vector.extract_strided_slice %167 {offsets = [0, 0], sizes = [8, 128], strides = [1, 1]} : vector<8x160xf32> to vector<8x128xf32>
    %169 = vector.broadcast %14 : f32 to vector<8x128xf32>
    %170 = arith.addf %168, %169 : vector<8x128xf32>
    %171 = arith.negf %170 : vector<8x128xf32>
    %172 = math.exp %171 : vector<8x128xf32>
    %cst_100 = arith.constant 1.000000e+00 : f32
    %173 = vector.broadcast %cst_100 : f32 to vector<8x128xf32>
    %174 = arith.addf %173, %172 : vector<8x128xf32>
    %175 = arith.divf %173, %174 : vector<8x128xf32>
    %176 = vector.extract_strided_slice %167 {offsets = [0, 128], sizes = [8, 32], strides = [1, 1]} : vector<8x160xf32> to vector<8x32xf32>
    %c0_101 = arith.constant 0 : index
    %c0_102 = arith.constant 0 : index
    %177 = vector.load %arg5[%c0_101, %c0_102] : memref<1x32xf32, #tpu.memory_space<vmem>>, vector<1x32xf32>
    %178 = vector.broadcast %177 : vector<1x32xf32> to vector<8x32xf32>
    %179 = arith.addf %176, %178 : vector<8x32xf32>
    %cst_103 = arith.constant 0.000000e+00 : f32
    %180 = vector.broadcast %cst_103 : f32 to vector<8x32xf32>
    %181 = arith.maximumf %179, %180 : vector<8x32xf32>
    %c0_104 = arith.constant 0 : index
    %c0_105 = arith.constant 0 : index
    %182 = vector.load %arg12[%c0_104, %c0_105] : memref<8x128xf32, #tpu.memory_space<vmem>>, vector<8x128xf32>
    %c0_106 = arith.constant 0 : index
    %c0_107 = arith.constant 0 : index
    %183 = vector.load %arg13[%c0_106, %c0_107] : memref<8x128xf32, #tpu.memory_space<vmem>>, vector<8x128xf32>
    %cst_108 = arith.constant 1.000000e+00 : f32
    %184 = vector.broadcast %cst_108 : f32 to vector<8x128xf32>
    %185 = arith.cmpf olt, %182, %184 : vector<8x128xf32>
    %186 = arith.extui %185 : vector<8x128xi1> to vector<8x128xi32>
    %187 = arith.sitofp %186 : vector<8x128xi32> to vector<8x128xf32>
    %188 = arith.mulf %175, %187 : vector<8x128xf32>
    %189 = arith.addf %182, %188 : vector<8x128xf32>
    %cst_109 = arith.constant 0.899999976 : f32
    %190 = vector.broadcast %cst_109 : f32 to vector<8x128xf32>
    %191 = arith.cmpf ogt, %189, %190 : vector<8x128xf32>
    %192 = arith.extui %191 : vector<8x128xi1> to vector<8x128xi32>
    %193 = arith.sitofp %192 : vector<8x128xi32> to vector<8x128xf32>
    %194 = arith.mulf %193, %187 : vector<8x128xf32>
    %cst_110 = arith.constant 0.899999976 : f32
    %195 = vector.broadcast %cst_110 : f32 to vector<8x128xf32>
    %196 = arith.cmpf ole, %189, %195 : vector<8x128xf32>
    %197 = arith.extui %196 : vector<8x128xi1> to vector<8x128xi32>
    %198 = arith.sitofp %197 : vector<8x128xi32> to vector<8x128xf32>
    %199 = arith.mulf %198, %187 : vector<8x128xf32>
    %200 = arith.mulf %175, %199 : vector<8x128xf32>
    %201 = arith.addf %182, %200 : vector<8x128xf32>
    %cst_111 = arith.constant 1.000000e+00 : f32
    %202 = vector.broadcast %cst_111 : f32 to vector<8x128xf32>
    %203 = arith.subf %202, %201 : vector<8x128xf32>
    %204 = arith.mulf %194, %203 : vector<8x128xf32>
    %205 = arith.addf %183, %204 : vector<8x128xf32>
    %206 = arith.mulf %194, %205 : vector<8x128xf32>
    %207 = arith.addf %201, %206 : vector<8x128xf32>
    %c0_112 = arith.constant 0 : index
    %c0_113 = arith.constant 0 : index
    %208 = vector.load %arg14[%c0_112, %c0_113] : memref<8x128xf32, #tpu.memory_space<vmem>>, vector<8x128xf32>
    %209 = arith.addf %208, %199 : vector<8x128xf32>
    %210 = arith.addf %209, %194 : vector<8x128xf32>
    %c0_114 = arith.constant 0 : index
    %c0_115 = arith.constant 0 : index
    %211 = vector.load %arg14[%c0_114, %c0_115] : memref<8x128xf32, #tpu.memory_space<vmem>>, vector<8x128xf32>
    tpu.vector_store %arg14[%c0_114, %c0_115], %210 {strides = array<i32>} : memref<8x128xf32, #tpu.memory_space<vmem>>, vector<8x128xf32>,
    %c0_116 = arith.constant 0 : index
    %c0_117 = arith.constant 0 : index
    %212 = vector.load %arg12[%c0_116, %c0_117] : memref<8x128xf32, #tpu.memory_space<vmem>>, vector<8x128xf32>
    tpu.vector_store %arg12[%c0_116, %c0_117], %207 {strides = array<i32>} : memref<8x128xf32, #tpu.memory_space<vmem>>, vector<8x128xf32>,
    %c0_118 = arith.constant 0 : index
    %c0_119 = arith.constant 0 : index
    %213 = vector.load %arg13[%c0_118, %c0_119] : memref<8x128xf32, #tpu.memory_space<vmem>>, vector<8x128xf32>
    tpu.vector_store %arg13[%c0_118, %c0_119], %205 {strides = array<i32>} : memref<8x128xf32, #tpu.memory_space<vmem>>, vector<8x128xf32>,
    %214 = arith.mulf %175, %199 : vector<8x128xf32>
    %215 = arith.mulf %194, %205 : vector<8x128xf32>
    %216 = arith.addf %214, %215 : vector<8x128xf32>
    %217 = vector.extract_strided_slice %216 {offsets = [0, 0], sizes = [8, 1], strides = [1, 1]} : vector<8x128xf32> to vector<8x1xf32>
    %218 = vector.shape_cast %217 : vector<8x1xf32> to vector<8x1xf32>
    %219 = vector.broadcast %218 : vector<8x1xf32> to vector<8x32xf32>
    %c0_120 = arith.constant 0 : index
    %c0_121 = arith.constant 0 : index
    %220 = vector.load %arg9[%c0_120, %c0_121] : memref<8x32xf32, #tpu.memory_space<vmem>>, vector<8x32xf32>
    tpu.vector_store %arg9[%c0_120, %c0_121], %181 {strides = array<i32>} : memref<8x32xf32, #tpu.memory_space<vmem>>, vector<8x32xf32>,
    %221 = arith.mulf %181, %219 : vector<8x32xf32>
    %c0_122 = arith.constant 0 : index
    %c0_123 = arith.constant 0 : index
    %222 = vector.load %arg10[%c0_122, %c0_123] : memref<8x32xf32, #tpu.memory_space<vmem>>, vector<8x32xf32>
    %cst_124 = arith.constant 1.000000e+00 : f32
    %223 = vector.broadcast %cst_124 : f32 to vector<8x32xf32>
    %224 = arith.subf %223, %219 : vector<8x32xf32>
    %225 = arith.mulf %222, %224 : vector<8x32xf32>
    %226 = arith.addf %221, %225 : vector<8x32xf32>
    %c0_125 = arith.constant 0 : index
    %c0_126 = arith.constant 0 : index
    %227 = vector.load %arg10[%c0_125, %c0_126] : memref<8x32xf32, #tpu.memory_space<vmem>>, vector<8x32xf32>
    tpu.vector_store %arg10[%c0_125, %c0_126], %226 {strides = array<i32>} : memref<8x32xf32, #tpu.memory_space<vmem>>, vector<8x32xf32>,
    %c3_i32 = arith.constant 3 : i32
    %c0_127 = arith.constant 0 : index
    %c0_128 = arith.constant 0 : index
    %228 = vector.load %arg9[%c0_127, %c0_128] : memref<8x32xf32, #tpu.memory_space<vmem>>, vector<8x32xf32>
    %c0_129 = arith.constant 0 : index
    %c0_130 = arith.constant 0 : index
    %229 = vector.load %arg11[%c0_129, %c0_130] : memref<8x32xf32, #tpu.memory_space<vmem>>, vector<8x32xf32>
    %230 = arith.addf %228, %229 : vector<8x32xf32>
    %231 = arith.index_cast %c3_i32 : i32 to index
    %c0_131 = arith.constant 0 : index
    %c0_132 = arith.constant 0 : index
    %232 = vector.load %arg3[%231, %c0_131, %c0_132] : memref<4x1x32xf32, #tpu.memory_space<vmem>>, vector<1x1x32xf32>
    %233 = vector.shape_cast %232 : vector<1x1x32xf32> to vector<1x32xf32>
    %234 = vector.broadcast %233 : vector<1x32xf32> to vector<8x32xf32>
    %235 = arith.addf %230, %234 : vector<8x32xf32>
    %236 = arith.truncf %235 : vector<8x32xf32> to vector<8x32xbf16>
    %c0_133 = arith.constant 0 : index
    %c0_134 = arith.constant 0 : index
    %237 = vector.load %arg4[%c0_133, %c0_134] : memref<32x160xbf16, #tpu.memory_space<vmem>>, vector<32x160xbf16>
    %cst_135 = arith.constant dense<0.000000e+00> : vector<8x160xf32>
    %238 = tpu.matmul %236, %237, %cst_135 {dimension_numbers = #tpu.dot_dimension_numbers<[1], [0], [0], [1], [0, 0, 1, 1], [], []>} : vector<8x32xbf16>, vector<32x160xbf16>, vector<8x160xf32> -> vector<8x160xf32>
    %239 = vector.extract_strided_slice %238 {offsets = [0, 0], sizes = [8, 128], strides = [1, 1]} : vector<8x160xf32> to vector<8x128xf32>
    %240 = vector.broadcast %14 : f32 to vector<8x128xf32>
    %241 = arith.addf %239, %240 : vector<8x128xf32>
    %242 = arith.negf %241 : vector<8x128xf32>
    %243 = math.exp %242 : vector<8x128xf32>
    %cst_136 = arith.constant 1.000000e+00 : f32
    %244 = vector.broadcast %cst_136 : f32 to vector<8x128xf32>
    %245 = arith.addf %244, %243 : vector<8x128xf32>
    %246 = arith.divf %244, %245 : vector<8x128xf32>
    %247 = vector.extract_strided_slice %238 {offsets = [0, 128], sizes = [8, 32], strides = [1, 1]} : vector<8x160xf32> to vector<8x32xf32>
    %c0_137 = arith.constant 0 : index
    %c0_138 = arith.constant 0 : index
    %248 = vector.load %arg5[%c0_137, %c0_138] : memref<1x32xf32, #tpu.memory_space<vmem>>, vector<1x32xf32>
    %249 = vector.broadcast %248 : vector<1x32xf32> to vector<8x32xf32>
    %250 = arith.addf %247, %249 : vector<8x32xf32>
    %cst_139 = arith.constant 0.000000e+00 : f32
    %251 = vector.broadcast %cst_139 : f32 to vector<8x32xf32>
    %252 = arith.maximumf %250, %251 : vector<8x32xf32>
    %c0_140 = arith.constant 0 : index
    %c0_141 = arith.constant 0 : index
    %253 = vector.load %arg12[%c0_140, %c0_141] : memref<8x128xf32, #tpu.memory_space<vmem>>, vector<8x128xf32>
    %c0_142 = arith.constant 0 : index
    %c0_143 = arith.constant 0 : index
    %254 = vector.load %arg13[%c0_142, %c0_143] : memref<8x128xf32, #tpu.memory_space<vmem>>, vector<8x128xf32>
    %cst_144 = arith.constant 1.000000e+00 : f32
    %255 = vector.broadcast %cst_144 : f32 to vector<8x128xf32>
    %256 = arith.cmpf olt, %253, %255 : vector<8x128xf32>
    %257 = arith.extui %256 : vector<8x128xi1> to vector<8x128xi32>
    %258 = arith.sitofp %257 : vector<8x128xi32> to vector<8x128xf32>
    %259 = arith.mulf %246, %258 : vector<8x128xf32>
    %260 = arith.addf %253, %259 : vector<8x128xf32>
    %cst_145 = arith.constant 0.899999976 : f32
    %261 = vector.broadcast %cst_145 : f32 to vector<8x128xf32>
    %262 = arith.cmpf ogt, %260, %261 : vector<8x128xf32>
    %263 = arith.extui %262 : vector<8x128xi1> to vector<8x128xi32>
    %264 = arith.sitofp %263 : vector<8x128xi32> to vector<8x128xf32>
    %265 = arith.mulf %264, %258 : vector<8x128xf32>
    %cst_146 = arith.constant 0.899999976 : f32
    %266 = vector.broadcast %cst_146 : f32 to vector<8x128xf32>
    %267 = arith.cmpf ole, %260, %266 : vector<8x128xf32>
    %268 = arith.extui %267 : vector<8x128xi1> to vector<8x128xi32>
    %269 = arith.sitofp %268 : vector<8x128xi32> to vector<8x128xf32>
    %270 = arith.mulf %269, %258 : vector<8x128xf32>
    %271 = arith.mulf %246, %270 : vector<8x128xf32>
    %272 = arith.addf %253, %271 : vector<8x128xf32>
    %cst_147 = arith.constant 1.000000e+00 : f32
    %273 = vector.broadcast %cst_147 : f32 to vector<8x128xf32>
    %274 = arith.subf %273, %272 : vector<8x128xf32>
    %275 = arith.mulf %265, %274 : vector<8x128xf32>
    %276 = arith.addf %254, %275 : vector<8x128xf32>
    %277 = arith.mulf %265, %276 : vector<8x128xf32>
    %278 = arith.addf %272, %277 : vector<8x128xf32>
    %c0_148 = arith.constant 0 : index
    %c0_149 = arith.constant 0 : index
    %279 = vector.load %arg14[%c0_148, %c0_149] : memref<8x128xf32, #tpu.memory_space<vmem>>, vector<8x128xf32>
    %280 = arith.addf %279, %270 : vector<8x128xf32>
    %281 = arith.addf %280, %265 : vector<8x128xf32>
    %c0_150 = arith.constant 0 : index
    %c0_151 = arith.constant 0 : index
    %282 = vector.load %arg14[%c0_150, %c0_151] : memref<8x128xf32, #tpu.memory_space<vmem>>, vector<8x128xf32>
    tpu.vector_store %arg14[%c0_150, %c0_151], %281 {strides = array<i32>} : memref<8x128xf32, #tpu.memory_space<vmem>>, vector<8x128xf32>,
    %c0_152 = arith.constant 0 : index
    %c0_153 = arith.constant 0 : index
    %283 = vector.load %arg12[%c0_152, %c0_153] : memref<8x128xf32, #tpu.memory_space<vmem>>, vector<8x128xf32>
    tpu.vector_store %arg12[%c0_152, %c0_153], %278 {strides = array<i32>} : memref<8x128xf32, #tpu.memory_space<vmem>>, vector<8x128xf32>,
    %c0_154 = arith.constant 0 : index
    %c0_155 = arith.constant 0 : index
    %284 = vector.load %arg13[%c0_154, %c0_155] : memref<8x128xf32, #tpu.memory_space<vmem>>, vector<8x128xf32>
    tpu.vector_store %arg13[%c0_154, %c0_155], %276 {strides = array<i32>} : memref<8x128xf32, #tpu.memory_space<vmem>>, vector<8x128xf32>,
    %285 = arith.mulf %246, %270 : vector<8x128xf32>
    %286 = arith.mulf %265, %276 : vector<8x128xf32>
    %287 = arith.addf %285, %286 : vector<8x128xf32>
    %288 = vector.extract_strided_slice %287 {offsets = [0, 0], sizes = [8, 1], strides = [1, 1]} : vector<8x128xf32> to vector<8x1xf32>
    %289 = vector.shape_cast %288 : vector<8x1xf32> to vector<8x1xf32>
    %290 = vector.broadcast %289 : vector<8x1xf32> to vector<8x32xf32>
    %c0_156 = arith.constant 0 : index
    %c0_157 = arith.constant 0 : index
    %291 = vector.load %arg9[%c0_156, %c0_157] : memref<8x32xf32, #tpu.memory_space<vmem>>, vector<8x32xf32>
    tpu.vector_store %arg9[%c0_156, %c0_157], %252 {strides = array<i32>} : memref<8x32xf32, #tpu.memory_space<vmem>>, vector<8x32xf32>,
    %292 = arith.mulf %252, %290 : vector<8x32xf32>
    %c0_158 = arith.constant 0 : index
    %c0_159 = arith.constant 0 : index
    %293 = vector.load %arg10[%c0_158, %c0_159] : memref<8x32xf32, #tpu.memory_space<vmem>>, vector<8x32xf32>
    %cst_160 = arith.constant 1.000000e+00 : f32
    %294 = vector.broadcast %cst_160 : f32 to vector<8x32xf32>
    %295 = arith.subf %294, %290 : vector<8x32xf32>
    %296 = arith.mulf %293, %295 : vector<8x32xf32>
    %297 = arith.addf %292, %296 : vector<8x32xf32>
    %c0_161 = arith.constant 0 : index
    %c0_162 = arith.constant 0 : index
    %298 = vector.load %arg10[%c0_161, %c0_162] : memref<8x32xf32, #tpu.memory_space<vmem>>, vector<8x32xf32>
    tpu.vector_store %arg10[%c0_161, %c0_162], %297 {strides = array<i32>} : memref<8x32xf32, #tpu.memory_space<vmem>>, vector<8x32xf32>,
    %c4_i32 = arith.constant 4 : i32
    %c0_163 = arith.constant 0 : index
    %c0_164 = arith.constant 0 : index
    %299 = vector.load %arg10[%c0_163, %c0_164] : memref<8x32xf32, #tpu.memory_space<vmem>>, vector<8x32xf32>
    %c0_165 = arith.constant 0 : index
    %c0_166 = arith.constant 0 : index
    %300 = vector.load %arg7[%c0_165, %c0_166] : memref<8x32xf32, #tpu.memory_space<vmem>>, vector<8x32xf32>
    tpu.vector_store %arg7[%c0_165, %c0_166], %299 {strides = array<i32>} : memref<8x32xf32, #tpu.memory_space<vmem>>, vector<8x32xf32>,
    %c0_167 = arith.constant 0 : index
    %c0_168 = arith.constant 0 : index
    %301 = vector.load %arg13[%c0_167, %c0_168] : memref<8x128xf32, #tpu.memory_space<vmem>>, vector<8x1xf32>
    %c0_169 = arith.constant 0 : index
    %c0_170 = arith.constant 0 : index
    %302 = vector.load %arg8[%c0_169, %c0_170] : memref<8x2xf32, #tpu.memory_space<vmem>>, vector<8x1xf32>
    tpu.vector_store %arg8[%c0_169, %c0_170], %301 {strides = array<i32>} : memref<8x2xf32, #tpu.memory_space<vmem>>, vector<8x1xf32>,
    %c0_171 = arith.constant 0 : index
    %c0_172 = arith.constant 0 : index
    %303 = vector.load %arg14[%c0_171, %c0_172] : memref<8x128xf32, #tpu.memory_space<vmem>>, vector<8x1xf32>
    %c0_173 = arith.constant 0 : index
    %c1 = arith.constant 1 : index
    %304 = vector.load %arg8[%c0_173, %c1] : memref<8x2xf32, #tpu.memory_space<vmem>>, vector<8x1xf32>
    tpu.vector_store %arg8[%c0_173, %c1], %303 {strides = array<i32>} : memref<8x2xf32, #tpu.memory_space<vmem>>, vector<8x1xf32>,
    return
  }
  func.func @transform_0(%arg0: i32) -> (i32, i32) {
    %c0_i32 = arith.constant 0 : i32
    %c0_i32_0 = arith.constant 0 : i32
    return %arg0, %c0_i32 : i32, i32
  }
  func.func @transform_1(%arg0: i32) -> (i32, i32) {
    %c0_i32 = arith.constant 0 : i32
    %c0_i32_0 = arith.constant 0 : i32
    %c0_i32_1 = arith.constant 0 : i32
    return %c0_i32, %c0_i32_0 : i32, i32
  }
  func.func @transform_2(%arg0: i32) -> (i32, i32, i32) {
    %c0_i32 = arith.constant 0 : i32
    %c0_i32_0 = arith.constant 0 : i32
    %c0_i32_1 = arith.constant 0 : i32
    %c0_i32_2 = arith.constant 0 : i32
    return %c0_i32, %c0_i32_0, %c0_i32_1 : i32, i32, i32
  }
  func.func @transform_3(%arg0: i32) -> (i32, i32) {
    %c0_i32 = arith.constant 0 : i32
    %c0_i32_0 = arith.constant 0 : i32
    %c0_i32_1 = arith.constant 0 : i32
    return %c0_i32, %c0_i32_0 : i32, i32
  }
  func.func @transform_4(%arg0: i32) -> (i32, i32) {
    %c0_i32 = arith.constant 0 : i32
    %c0_i32_0 = arith.constant 0 : i32
    %c0_i32_1 = arith.constant 0 : i32
    return %c0_i32, %c0_i32_0 : i32, i32
  }
  func.func @transform_5(%arg0: i32) -> i32 {
    %c0_i32 = arith.constant 0 : i32
    %c0_i32_0 = arith.constant 0 : i32
    return %c0_i32 : i32
  }
  func.func @transform_6(%arg0: i32) -> (i32, i32) {
    %c0_i32 = arith.constant 0 : i32
    %c0_i32_0 = arith.constant 0 : i32
    return %arg0, %c0_i32 : i32, i32
  }
  func.func @transform_7(%arg0: i32) -> (i32, i32) {
    %c0_i32 = arith.constant 0 : i32
    %c0_i32_0 = arith.constant 0 : i32
    return %arg0, %c0_i32 : i32, i32
  }
}

</mosaic_0001>

<bundles_post_ra>
// kernel: tpu_custom_call.1
= control target key start
LH: loop header
LB: loop body
LE: loop exit
PB: predicated region body
PF: predicated region fallthrough
CT: control target
= control target key end

     0   :  { %s1807_s0 = inlined_call_operand.hbm [shape: f32[16,32], index: 0, kind: input, shape index: {}]   ;;  %s1808_s1 = inlined_call_operand.hbm [shape: f32[8,32], index: 1, kind: input, shape index: {}]   ;;  %s1809_s2 = inlined_call_operand.hbm [shape: f32[4,1,32], index: 2, kind: input, shape index: {}]   ;;  %s1810_s3 = inlined_call_operand.hbm [shape: bf16[32,160], index: 3, kind: input, shape index: {}]   ;;  %s1811_s4 = inlined_call_operand.vmem [shape: f32[1,32], index: 4, kind: input, shape index: {}]   ;;  %s1812_s5 = inlined_call_operand.<no memory space> [shape: f32[1], index: 5, kind: input, shape index: {}]   ;;  %s1813_s6 = inlined_call_operand.hbm [shape: f32[16,32], index: 6, kind: output, shape index: {0}]   ;;  %s1814_s7 = inlined_call_operand.vmem [shape: f32[16,2], index: 7, kind: output, shape index: {1}]  }
   0x1   :  { %13 = sst [smem:[#allocation8]] %s1812_s5 }
   0x2   :  { %14 = vsyncpa [#allocation10], 0 }
   0x3   :  { %16 = vsyncpa [#allocation10 + $0x1], 0 }
   0x4   :  { %17 = vsyncpa [#allocation13], 0 }
   0x5   :  { %18 = vsyncpa [#allocation16], 0 }
   0x6   :  { %19 = vsyncpa [#allocation11], 0 }
   0x7   :  { %21 = vsyncpa [#allocation11 + $0x1], 0  ;;  %s1527_s26 = smov 0   ;;  %s1529_s27 = smov 0  }
   0x8   :  { %s1531_s28 = smov 0   ;;  %s1533_s29 = smov 0  }
   0x9 LB: > { %s1548_s5 = sadd.s32 4294967295, %s1472_s29   ;;  %s1045_s30 = sadd.s32 4294967294, %s1472_s29   ;;  %s1472_s29 = sphi %s1533_s29, %s1825_s29   ;;  %s1468_s28 = sphi %s1531_s28, %s1824_s28   ;;  %s1464_s27 = sphi %s1529_s27, %s1823_s27   ;;  %s1460_s26 = sphi %s1527_s26, %s1822_s26  }
   0xa   : > { %p47_p0 = scmp.ne.s32.totalorder %s1464_s27, %s1460_s26  ;;  %p48_p1 = scmp.eq.s32.totalorder %s1548_s5, 0 }
   0xb   : > { %p176_p2 = scmp.eq.s32.totalorder %s1548_s5, 1  ;;  %p182_p3 = scmp.eq.s32.totalorder %s1045_s30, 1 }
   0xc   : > { %p1557_p4 = por %p48_p1, %p47_p0  ;;  %p1046_p5 = scmp.ge.s32.totalorder %s1472_s29, 1 }
   0xd   : > { %p1562_p6 = por %p182_p3, %p47_p0  ;;  %p215_p7 = scmp.lt.s32.totalorder %s1472_s29, 3 }
   0xe   : > { %s227_s12 = sshll.u32 %s1808_s1, 4  ;;  %s1474_s14 = smov [#allocation12]   ;;  %s228_s12 = int_to_ptr.hbm [resolvable:$true] %s227_s12 }
   0xf   : > { %p1570_p8 = pnand %p1046_p5, %p215_p7  ;;  %s229_s15 = sshll.u32 %s1474_s14, 4  ;;  %s230_s15 = int_to_ptr.vmem [resolvable:$true] %s229_s15 }
  0x10   : > { %s238_s18 = sshll.u32 %s1809_s2, 4  ;;  %s1475_s20 = smov [#allocation14]   ;;  %s239_s18 = int_to_ptr.hbm [resolvable:$true] %s238_s18 }
  0x11   : > { %p1184_p10 = pneg %p1570_p8  ;;  %s240_s21 = sshll.u32 %s1475_s20, 4  ;;  %s241_s21 = int_to_ptr.vmem [resolvable:$true] %s240_s21 }
  0x12   : > { %s1476_s22 = smov 16   ;;  %s1477_s23 = smov 1  }
  0x13   : > { %p1582_p11 = pnand %p1184_p10, %p48_p1  ;;  %s252_s30 = sshll.u32 %s1810_s3, 4  ;;  %s253_s30 = int_to_ptr.hbm [resolvable:$true] %s252_s30 }
  0x14   : > { %s1478_s10 = smov [#allocation15]   ;;  %s1480_s14 = smov 8  }
  0x15   : > { %1187 = dma.hbm_to_vmem [thread:$0]  (!%p1582_p11), %s228_s12, 128, %s230_s15, [#allocation13]  }
  0x16   : > { %1190 = dma.hbm_to_vmem [thread:$0]  (!%p1582_p11), %s239_s18, 64, %s241_s21, [#allocation13], %s1476_s22, %s1476_s22, %s1477_s23  }
  0x17   : > { %s254_s11 = sshll.u32 %s1478_s10, 4  ;;  %s1479_s12 = smov 128   ;;  %s255_s11 = int_to_ptr.vmem [resolvable:$true] %s254_s11 }
  0x18   : > { %1193 = dma.hbm_to_vmem [thread:$0]  (!%p1582_p11), %s253_s30, 512, %s255_s11, [#allocation16], %s1479_s12, %s1479_s12, %s1480_s14  }
  0x19   : > { %s1596_s15 = sadd.s32 1, %s1472_s29   ;;  %s34_s17 = sadd.s32 1, %s1468_s28 }
  0x1a   : > { %s31_s16 = ssub.s32 %s1472_s29, %s1596_s15  ;;  %p41_p13 = scmp.ne.s32.totalorder %s1468_s28, %s1464_s27 }
  0x1b   : > { %p32_p12 = scmp.eq.s32.totalorder %s31_s16, 0  ;;  %p42_p0 = scmp.eq.s32.totalorder %s1472_s29, 0 }
  0x1c   : > { %p1609_p3 = por %p176_p2, %p41_p13  ;;  %p1205_p5 = scmp.lt.s32.totalorder %s1472_s29, 2 }
  0x1d   : > { %s1605_s18 = scalar_select %p32_p12, %s1468_s28, %s34_s17  }
  0x1e   : > { %s274_s21 = sand.u32 1, %s1468_s28   ;;  %s1052_s22 = sshll.u32 %s1472_s29, 3 }
  0x1f   : > { %p43_p7 = por %p42_p0, %p41_p13  ;;  %s1051_s19 = sshll.u32 %s274_s21, 3 }
  0x20   : > { %s282_s25 = scalar_lea.hbm %s1807_s0, %s1052_s22  ;;  %s278_s10 = scalar_lea.vmem [#allocation9], %s1051_s19 }
  0x21   : > { %s284_s30 = sshll.u32 %s282_s25, 4  ;;  %s286_s11 = sshll.u32 %s278_s10, 4  ;;  %s285_s30 = int_to_ptr.hbm [resolvable:$true] %s284_s30  ;;  %s287_s11 = int_to_ptr.vmem [resolvable:$true] %s286_s11 }
  0x22   : > { %p1619_p10 = pnand %p1205_p5, %p43_p7  ;;  %s275_s14 = scalar_lea.sflag [#allocation10], %s274_s21 }
  0x23   : > { %s1368_s16 = sshra.s32 %s285_s30, 4  ;;  %s1375_s19 = scalar_lea.hbm %s1807_s0, 16  ;;  %s1369_s16 = int_to_ptr.hbm [resolvable:$true] %s1368_s16 }
  0x24   : > { %s1370_s17 = scalar_lea.hbm %s1369_s16, 8  ;;  %p1372_p11 = pneg %p1619_p10 }
  0x25   : > { %p1371_p2 = scmp.ne.s32.totalorder %s1369_s16, %s1370_s17  ;;  %p1376_p0 = scmp.lt.s32.totalorder %s1369_s16, %s1807_s0 }
  0x26   : > { %p1377_p5 = scmp.lt.s32.totalorder %s1375_s19, %s1370_s17 }
  0x27   : > { %p1373_p12 = pnand %p1372_p11, %p1371_p2 }
  0x28   : > { %p1378_p7 = por %p1377_p5, %p1376_p0 }
  0x29   : > { %p1374_p13 = pneg %p1373_p12 }
  0x2b   : > { %p1379_p9 = pnand %p1378_p7, %p1374_p13 }
  0x2d   : > { %1382 = shalt.err (!%p1379_p9)
}
  0x2e   : > { %1197 = dma.hbm_to_vmem [thread:$0]  (!%p1619_p10), %s285_s30, 128, %s287_s11, %s275_s14  }
  0x2f   : > { %295 = sbr.rel (%p1570_p8) target bundleno = 830 (0x33e), region = 44  ;;  %s1636_s21 = sand.u32 (!%p1570_p8), 1, %s1464_s27  }
  0x30   : > { %s1054_s10 = sshll.u32 (!%p1570_p8), %s1636_s21, 3  ;;  %s298_s22 = scalar_lea.sflag (!%p1570_p8), [#allocation10], %s1636_s21 }
  0x31   : > { %s301_s16 = scalar_lea.vmem (!%p1570_p8), [#allocation9], %s1054_s10 }
  0x34   : > { %1443 = dma.done.wait (%p1557_p4), %s298_s22, 128  }
  0x35   : > { %1445 = vsyncadd (%p1557_p4), %s298_s22, 4294967168 }
  0x36   : > { %1447 = dma.done.wait (%p48_p1), [#allocation13], 192  }
  0x37   : > { %1449 = vsyncadd (%p48_p1), [#allocation13], 4294967104 }
  0x38   : > { %1451 = dma.done.wait (%p48_p1), [#allocation16], 512  }
  0x39   : > { %1453 = vsyncadd (%p48_p1), [#allocation16], 4294966784  ;;  %vm358_vm0 = vcmask 261120   ;;  %v1070_v0 = vld [vmem:[#allocation15 + $0x10] sm:$0xf]  ;;  %v364_v12 = vld [vmem:[#allocation12] sm:$0xff] }
  0x3a   : > { %v1155_v1 = vld [vmem:[#allocation15 + $0x14] sm:$0xf0]  ;;  %v1154_v2 = vld [vmem:[#allocation15 + $0x14] sm:$0xf]  ;;  %v1072_v4 = vld [vmem:[#allocation15 + $0x18] sm:$0xf0] }
  0x3b   : > { %v1071_v3 = vor.u32 %v1155_v1, %v1070_v0  ;;  %v1062_v5 = vld [vmem:[#allocation15] sm:$0xf]  ;;  %v1153_v6 = vld [vmem:[#allocation15 + $0x4] sm:$0xf0]  ;;  %v1075_v7 = vor.u32 %v1154_v2, %v1072_v4  ;;  %v1152_v8 = vld [vmem:[#allocation15 + $0x4] sm:$0xf] }
  0x3c   : > { %v1064_v9 = vld [vmem:[#allocation15 + $0x8] sm:$0xf0]  ;;  %v1063_v11 = vor.u32 %v1153_v6, %v1062_v5  ;;  %365 = vst.msk [vmem:[#allocation4] sm:$0xff] %vm358_vm0, %v364_v12  ;;  %v1254_v15 = vld [vmem:[#allocation14] ss:$0 sm:$0xff]  ;;  %s366_s8 = sld [smem:[#allocation8]] }
  0x3d   : > { %v357_v10 = vld [vmem:[%s301_s16] sm:$0xff]  ;;  %409 = vmatpush.bf16.msra.mxu0 %v1071_v3  ;;  %422 = vmatpush.bf16.msra.mxu1 %v1075_v7  ;;  %v1067_v13 = vor.u32 %v1152_v8, %v1064_v9  ;;  %v1159_v21 = vld [vmem:[#allocation15 + $0x14] sm:$0xf0]  ;;  %v1158_v22 = vld [vmem:[#allocation15 + $0x14] sm:$0xf]  ;;  %v1481_v32 = vmov 0  }
  0x3e   : > { %359 = vst.msk [vmem:[#allocation2] sm:$0xff] %vm358_vm0, %v357_v10  ;;  %v1092_v20 = vld [vmem:[#allocation15 + $0x10] sm:$0xf]  ;;  %v1094_v24 = vld [vmem:[#allocation15 + $0x18] sm:$0xf0]  ;;  %1252 = vset.pattern.permute.xlu0 %v1481_v32  ;;  %v1482_v33 = vmov 0.0   ;;  %1253 = vset.pattern.permute.xlu1 %v1481_v32 }
  0x3f   : > { %v1093_v23 = vor.u32 %v1159_v21, %v1092_v20  ;;  %v1097_v25 = vor.u32 %v1158_v22, %v1094_v24  ;;  %v1084_v26 = vld [vmem:[#allocation15] sm:$0xf]  ;;  %v1157_v27 = vld [vmem:[#allocation15 + $0x4] sm:$0xf0]  ;;  %v1156_v28 = vld [vmem:[#allocation15 + $0x4] sm:$0xf] }
  0x40   : > { %v1085_v29 = vor.u32 %v1157_v27, %v1084_v26  ;;  %v1086_v30 = vld [vmem:[#allocation15 + $0x8] sm:$0xf0]  ;;  %360 = vst.msk [vmem:[#allocation3] sm:$0xff] %vm358_vm0, %v1482_v33  ;;  %v1256_v45 = vld [vmem:[#allocation14 + $0x1] ss:$0 sm:$0xff]  ;;  %p352_p1 = scmp.lt.s32.totalorder %s1548_s5, 1 }
  0x41   : > { %410 = vmatpush.bf16.msra.mxu0 %v1063_v11  ;;  %423 = vmatpush.bf16.msra.mxu1 %v1067_v13  ;;  %v1089_v31 = vor.u32 %v1156_v28, %v1086_v30  ;;  %v1255_v34 = vld [vmem:[%s1811_s4] ss:$0 sm:$0xff]  ;;  %v1162_v5 = vld [vmem:[#allocation15 + $0x14] sm:$0xf]  ;;  %v1116_v6 = vld [vmem:[#allocation15 + $0x18] sm:$0xf0] }
  0x42   : > { %540 = vmatpush.bf16.msra.mxu2 %v1093_v23  ;;  %553 = vmatpush.bf16.msra.mxu3 %v1097_v25  ;;  %v1666_v35 = vstv %s366_s8  ;;  %v1119_v7 = vor.u32 %v1162_v5, %v1116_v6  ;;  %v1114_v8 = vld [vmem:[#allocation15 + $0x10] sm:$0xf]  ;;  %v1163_v9 = vld [vmem:[#allocation15 + $0x14] sm:$0xf0]  ;;  %v1160_v11 = vld [vmem:[#allocation15 + $0x4] sm:$0xf] }
  0x43   : > { %v1656_v16 = vld [vmem:[#allocation4] sm:$0xff]  ;;  %v1115_v10 = vor.u32 %v1163_v9, %v1114_v8  ;;  %v1108_v12 = vld [vmem:[#allocation15 + $0x8] sm:$0xf0]  ;;  %v1136_v8 = vld [vmem:[#allocation15 + $0x10] sm:$0xf]  ;;  %s353_s24 = scalar_select %p352_p1, %s1548_s5, 1 }
  0x44   : > { %v1106_v13 = vld [vmem:[#allocation15] sm:$0xf]  ;;  %v1167_v9 = vld [vmem:[#allocation15 + $0x14] sm:$0xf0]  ;;  %s1483_s25 = smov 1   ;;  %s1149_s30 = sshll.u32 %s1548_s5, 3 }
  0x45   : > { %v367_v14 = vld [vmem:[#allocation2] sm:$0xff]  ;;  %683 = vmatpush.bf16.msrb.mxu1 %v1119_v7  ;;  %670 = vmatpush.bf16.msrb.mxu0 %v1115_v10  ;;  %v1166_v10 = vld [vmem:[#allocation15 + $0x14] sm:$0xf]  ;;  %s1059_s22 = sshll.u32 %s353_s24, 3  ;;  %s914_s14 = scalar_lea.hbm %s1813_s6, %s1149_s30 }
  0x46   : > { %v369_v17 = vadd.f32 %v1656_v16, %v367_v14  ;;  %541 = vmatpush.bf16.msra.mxu2 %v1085_v29  ;;  %554 = vmatpush.bf16.msra.mxu3 %v1089_v31  ;;  %v1111_v14 = vor.u32 %v1160_v11, %v1108_v12  ;;  %v1137_v11 = vor.u32 %v1167_v9, %v1136_v8  ;;  %s355_s13 = scalar_lea.vmem %s1814_s7, %s1059_s22  ;;  %s345_s17 = scalar_lea.vmem [#allocation17], %s1054_s10 }
  0x47   : > { %v492_v25 = vld [vmem:[#allocation3] sm:$0xff]  ;;  %s916_s23 = sshll.u32 %s345_s17, 4  ;;  %s918_s19 = sshll.u32 %s914_s14, 4  ;;  %s917_s23 = int_to_ptr.vmem [resolvable:$true] %s916_s23  ;;  %s919_s19 = int_to_ptr.hbm [resolvable:$true] %s918_s19 }
  0x48   : > { %v374_v18 = vadd.f32 %v1254_v15, %v369_v17  ;;  %v1161_v15 = vld [vmem:[#allocation15 + $0x4] sm:$0xf0]  ;;  %s900_s24 = scalar_lea.sflag [#allocation11], %s1636_s21  ;;  %s1418_s8 = scalar_lea.hbm %s1813_s6, 16 }
  0x49   : > { %v1107_v17 = vor.u32 %v1161_v15, %v1106_v13  ;;  %684 = vmatpush.bf16.msrb.mxu1 %v1111_v14  ;;  %v1165_v13 = vld [vmem:[#allocation15 + $0x4] sm:$0xf0]  ;;  %v1164_v14 = vld [vmem:[#allocation15 + $0x4] sm:$0xf] }
  0x4a   : > { %v375_v19 = vpack.c.bf16 %v374_v18, %v374_v18  ;;  %v1257_v18 = vld [vmem:[%s1811_s4] ss:$0 sm:$0xff]  ;;  %800 = vmatpush.bf16.msrb.mxu2 %v1137_v11 }
  0x4b   : > { %671 = vmatpush.bf16.msrb.mxu0 %v1107_v17 }
  0x4c   : > { %1076 = vmatmul.msk.bf16.vlgmr.msra.gmra.mxu0 %vm358_vm0, %v375_v19  ;;  %1077 = vmatmul.msk.bf16.vlgmr.msra.gmra.mxu1 %vm358_vm0, %v375_v19 }
  0xc9   : > { %v412_v36 = vpop.f32.mrf.mxu0  ;;  %v425_v37 = vpop.f32.mrf.mxu1 }
  0xca   : > { %v430_v38 = vadd.f32 %v1666_v35, %v412_v36  ;;  %v1669_v39 = vadd.f32 %v1255_v34, %v425_v37  ;;  %v1258_v34 = vld [vmem:[#allocation14 + $0x2] ss:$0 sm:$0xff] }
  0xcc   : > { %v1078_v40 = vmul.f32 -1.442695, %v430_v38  ;;  %v455_v41 = vmax.f32 %v1669_v39, 0.0 }
  0xce   : > { %1262 = vpow2.f32 %v1078_v40  ;;  %490 = vst.msk [vmem:[#allocation2] sm:$0xff] %vm358_vm0, %v455_v41 }
  0xd1   : > { %v427_v42 = vpop.f32.mrf.mxu1  ;;  %v414_v43 = vpop.f32.mrf.mxu0 }
  0xd4   : > { %v1263_v44 = vpop.eup %1262 }
  0xd5   : > { %v434_v46 = vadd.f32 1.0, %v1263_v44  ;;  %v497_v47 = vld [vmem:[#allocation2] sm:$0xff] }
  0xd6   : > { %v499_v48 = vadd.f32 %v497_v47, %v1656_v16 }
  0xd7   : > { %1264 = vrcp.f32 %v434_v46  ;;  %v446_v53 = vand.u32 2147483648, %v434_v46  ;;  %vm440_vm1 = vweird.f32 %v434_v46  ;;  %v444_v55 = vand.u32 2147483647, %v434_v46 }
  0xd8   : > { %v505_v49 = vadd.f32 %v1256_v45, %v499_v48 }
  0xd9   : > { %v447_v57 = vor.u32 1.1754944e-38, %v446_v53  ;;  %vm445_vm4 = vcmp.eq.f32.partialorder %v444_v55, 8.507059e+37 }
  0xda   : > { %v506_v50 = vpack.c.bf16 %v505_v49, %v505_v49 }
  0xdc   : > { %1098 = vmatmul.msk.bf16.vlgmr.msra.gmra.mxu2 %vm358_vm0, %v506_v50  ;;  %1099 = vmatmul.msk.bf16.vlgmr.msra.gmra.mxu3 %vm358_vm0, %v506_v50 }
  0xdd   : > { %v1265_v51 = vpop.eup %1264 }
  0xde   : > { %v436_v52 = vmul.f32 %v1265_v51, %v434_v46  ;;  %vm441_vm2 = vweird.f32 %v1265_v51 }
  0xdf   : > { %vm442_vm3 = vmor %vm440_vm1, %vm441_vm2 }
  0xe0   : > { %v437_v54 = vsub.f32 1.0, %v436_v52 }
  0xe2   : > { %v438_v56 = vmul.f32 %v1265_v51, %v437_v54 }
  0xe4   : > { %v439_v58 = vadd.f32 %v1265_v51, %v438_v56 }
  0xe6   : > { %v443_v59 = vsel %vm442_vm3, %v1265_v51, %v439_v58 }
  0xe7   : > { %v448_v60 = vsel %vm445_vm4, %v447_v57, %v443_v59 }
  0xe8   : > { %vm463_vm5 = vcmp.gt.f32.partialorder %v448_v60, 0.9  ;;  %vm467_vm6 = vcmp.le.f32.partialorder %v448_v60, 0.9 }
  0xe9   : > { %v1080_v61 = vsel %vm463_vm5, 1.0, %v1482_v33  ;;  %v1081_v62 = vsel %vm467_vm6, 1.0, %v1482_v33 }
  0xea   : > { %v471_v63 = vmul.f32 %v1081_v62, %v448_v60  ;;  %v1680_v0 = vadd.f32 %v1081_v62, %v1080_v61 }
  0xec   : > { %v473_v1 = vsub.f32 1.0, %v471_v63 }
  0xee   : > { %v1682_v2 = vmul.f32 %v1080_v61, %v473_v1 }
  0xf0   : > { %v476_v3 = vmul.f32 %v1080_v61, %v1682_v2 }
  0xf2   : > { %v1685_v4 = vadd.f32 %v476_v3, %v471_v63 }
  0xf4   : > { %487 = vperm.xlu0 %1252, %v1685_v4   ;;  %vm588_vm8 = vcmp.lt.f32.partialorder %v1685_v4, 1.0 }
  0xf5   : > { %v1101_v50 = vsel %vm588_vm8, 1.0, %v1482_v33 }
 0x15f   : > { %v543_v19 = vpop.f32.mrf.mxu2  ;;  %v556_v20 = vpop.f32.mrf.mxu3 }
 0x160   : > { %v560_v21 = vadd.f32 %v543_v19, %v1666_v35  ;;  %v1692_v22 = vadd.f32 %v1257_v18, %v556_v20  ;;  %v1259_v18 = vld [vmem:[%s1811_s4] ss:$0 sm:$0xff] }
 0x162   : > { %v1100_v23 = vmul.f32 -1.442695, %v560_v21  ;;  %v585_v24 = vmax.f32 %v1692_v22, 0.0 }
 0x164   : > { %1266 = vpow2.f32 %v1100_v23  ;;  %620 = vst.msk [vmem:[#allocation2] sm:$0xff] %vm358_vm0, %v585_v24 }
 0x166   : > { %v488_v26 = vpop.permute.xlu0 %487 }
 0x167   : > { %v493_v27 = vsub.f32 1.0, %v488_v26  ;;  %v545_v28 = vpop.f32.mrf.mxu2  ;;  %v558_v29 = vpop.f32.mrf.mxu3  ;;  %v491_v30 = vmul.f32 %v488_v26, %v455_v41 }
 0x169   : > { %v494_v31 = vmul.f32 %v493_v27, %v492_v25 }
 0x16a   : > { %v1267_v32 = vpop.eup %1266 }
 0x16b   : > { %v564_v36 = vadd.f32 1.0, %v1267_v32  ;;  %v495_v37 = vadd.f32 %v494_v31, %v491_v30  ;;  %v627_v38 = vld [vmem:[#allocation2] sm:$0xff]  ;;  %v1260_v30 = vld [vmem:[#allocation14 + $0x3] ss:$0 sm:$0xff] }
 0x16c   : > { %v629_v40 = vadd.f32 %v627_v38, %v1656_v16 }
 0x16d   : > { %1268 = vrcp.f32 %v564_v36  ;;  %496 = vst.msk [vmem:[#allocation3] sm:$0xff] %vm358_vm0, %v495_v37  ;;  %v576_v45 = vand.u32 2147483648, %v564_v36  ;;  %v574_v47 = vand.u32 2147483647, %v564_v36  ;;  %vm570_vm9 = vweird.f32 %v564_v36 }
 0x16e   : > { %v635_v42 = vadd.f32 %v1258_v34, %v629_v40 }
 0x16f   : > { %v577_v49 = vor.u32 1.1754944e-38, %v576_v45  ;;  %vm575_vm11 = vcmp.eq.f32.partialorder %v574_v47, 8.507059e+37 }
 0x170   : > { %v636_v43 = vpack.c.bf16 %v635_v42, %v635_v42 }
 0x172   : > { %1120 = vmatmul.msk.bf16.vlgmr.msrb.gmra.mxu0 %vm358_vm0, %v636_v43  ;;  %1121 = vmatmul.msk.bf16.vlgmr.msrb.gmra.mxu1 %vm358_vm0, %v636_v43 }
 0x173   : > { %v1269_v44 = vpop.eup %1268 }
 0x174   : > { %v566_v39 = vmul.f32 %v1269_v44, %v564_v36  ;;  %vm571_vm7 = vweird.f32 %v1269_v44 }
 0x175   : > { %vm572_vm10 = vmor %vm570_vm9, %vm571_vm7 }
 0x176   : > { %v567_v41 = vsub.f32 1.0, %v566_v39 }
 0x178   : > { %v568_v46 = vmul.f32 %v1269_v44, %v567_v41  ;;  %v622_v41 = vld [vmem:[#allocation3] sm:$0xff] }
 0x17a   : > { %v569_v48 = vadd.f32 %v1269_v44, %v568_v46 }
 0x17c   : > { %v573_v51 = vsel %vm572_vm10, %v1269_v44, %v569_v48 }
 0x17d   : > { %v578_v52 = vsel %vm575_vm11, %v577_v49, %v573_v51 }
 0x17e   : > { %v591_v53 = vmul.f32 %v1101_v50, %v578_v52 }
 0x180   : > { %v592_v54 = vadd.f32 %v591_v53, %v1685_v4 }
 0x182   : > { %vm593_vm12 = vcmp.gt.f32.partialorder %v592_v54, 0.9  ;;  %vm597_vm13 = vcmp.le.f32.partialorder %v592_v54, 0.9 }
 0x183   : > { %v1102_v55 = vsel %vm593_vm12, 1.0, %v1482_v33  ;;  %v1103_v56 = vsel %vm597_vm13, 1.0, %v1482_v33  ;;  %vm890_vm13 = vcmask 7168  }
 0x184   : > { %v600_v57 = vmul.f32 %v1103_v56, %v1101_v50  ;;  %v596_v58 = vmul.f32 %v1102_v55, %v1101_v50 }
 0x186   : > { %v601_v59 = vmul.f32 %v600_v57, %v578_v52  ;;  %v609_v60 = vadd.f32 %v600_v57, %v1680_v0  ;;  %v1138_v0 = vld [vmem:[#allocation15 + $0x18] sm:$0xf0] }
 0x187   : > { %v1141_v12 = vor.u32 %v1166_v10, %v1138_v0  ;;  %v1261_v10 = vld [vmem:[%s1811_s4] ss:$0 sm:$0xff] }
 0x188   : > { %v602_v61 = vadd.f32 %v601_v59, %v1685_v4  ;;  %v1711_v62 = vadd.f32 %v609_v60, %v596_v58  ;;  %v1128_v4 = vld [vmem:[#allocation15] sm:$0xf] }
 0x189   : > { %813 = vmatpush.bf16.msrb.mxu3 %v1141_v12  ;;  %v1129_v15 = vor.u32 %v1165_v13, %v1128_v4 }
 0x18a   : > { %v603_v63 = vsub.f32 1.0, %v602_v61 }
 0x18b   : > { %801 = vmatpush.bf16.msrb.mxu2 %v1129_v15 }
 0x18c   : > { %v604_v1 = vmul.f32 %v603_v63, %v596_v58 }
 0x18e   : > { %v1714_v3 = vadd.f32 %v604_v1, %v1682_v2  ;;  %v1130_v2 = vld [vmem:[#allocation15 + $0x8] sm:$0xf0] }
 0x18f   : > { %v1133_v17 = vor.u32 %v1164_v14, %v1130_v2 }
 0x190   : > { %v606_v5 = vmul.f32 %v1714_v3, %v596_v58 }
 0x191   : > { %814 = vmatpush.bf16.msrb.mxu3 %v1133_v17 }
 0x192   : > { %v614_v6 = vadd.f32 %v606_v5, %v601_v59  ;;  %v1717_v7 = vadd.f32 %v606_v5, %v602_v61 }
 0x194   : > { %617 = vperm.xlu0 %1252, %v614_v6   ;;  %vm718_vm1 = vcmp.lt.f32.partialorder %v1717_v7, 1.0 }
 0x195   : > { %v1123_v53 = vsel %vm718_vm1, 1.0, %v1482_v33 }
 0x1ef   : > { %v673_v19 = vpop.f32.mrf.mxu0  ;;  %v686_v20 = vpop.f32.mrf.mxu1 }
 0x1f0   : > { %v690_v21 = vadd.f32 %v673_v19, %v1666_v35  ;;  %v1723_v23 = vadd.f32 %v1259_v18, %v686_v20 }
 0x1f2   : > { %v1122_v25 = vmul.f32 -1.442695, %v690_v21  ;;  %v715_v26 = vmax.f32 %v1723_v23, 0.0 }
 0x1f4   : > { %1270 = vpow2.f32 %v1122_v25  ;;  %750 = vst.msk [vmem:[#allocation2] sm:$0xff] %vm358_vm0, %v715_v26 }
 0x1f7   : > { %v675_v27 = vpop.f32.mrf.mxu0  ;;  %v688_v28 = vpop.f32.mrf.mxu1 }
 0x1fa   : > { %v1271_v29 = vpop.eup %1270 }
 0x1fb   : > { %v694_v31 = vadd.f32 1.0, %v1271_v29  ;;  %v757_v32 = vld [vmem:[#allocation2] sm:$0xff] }
 0x1fc   : > { %v759_v34 = vadd.f32 %v757_v32, %v1656_v16 }
 0x1fd   : > { %1272 = vrcp.f32 %v694_v31  ;;  %v706_v39 = vand.u32 2147483648, %v694_v31  ;;  %v704_v46 = vand.u32 2147483647, %v694_v31  ;;  %vm700_vm15 = vweird.f32 %v694_v31 }
 0x1fe   : > { %v765_v36 = vadd.f32 %v1260_v30, %v759_v34 }
 0x1ff   : > { %v707_v50 = vor.u32 1.1754944e-38, %v706_v39  ;;  %vm705_vm3 = vcmp.eq.f32.partialorder %v704_v46, 8.507059e+37 }
 0x200   : > { %v766_v37 = vpack.c.bf16 %v765_v36, %v765_v36 }
 0x202   : > { %1142 = vmatmul.msk.bf16.vlgmr.msrb.gmra.mxu2 %vm358_vm0, %v766_v37  ;;  %1143 = vmatmul.msk.bf16.vlgmr.msrb.gmra.mxu3 %vm358_vm0, %v766_v37 }
 0x203   : > { %v1273_v38 = vpop.eup %1272 }
 0x204   : > { %v696_v40 = vmul.f32 %v1273_v38, %v694_v31  ;;  %vm701_vm14 = vweird.f32 %v1273_v38 }
 0x205   : > { %vm702_vm2 = vmor %vm700_vm15, %vm701_vm14  ;;  %vm897_vm14 = vcmask 15368  }
 0x206   : > { %v618_v42 = vpop.permute.xlu0 %617  ;;  %v697_v43 = vsub.f32 1.0, %v696_v40 }
 0x207   : > { %v623_v44 = vsub.f32 1.0, %v618_v42  ;;  %v621_v16 = vmul.f32 %v618_v42, %v585_v24 }
 0x208   : > { %v698_v45 = vmul.f32 %v1273_v38, %v697_v43 }
 0x209   : > { %v624_v47 = vmul.f32 %v623_v44, %v622_v41 }
 0x20a   : > { %v699_v48 = vadd.f32 %v1273_v38, %v698_v45 }
 0x20b   : > { %v625_v49 = vadd.f32 %v624_v47, %v621_v16 }
 0x20c   : > { %v703_v51 = vsel %vm702_vm2, %v1273_v38, %v699_v48 }
 0x20d   : > { %626 = vst.msk [vmem:[#allocation3] sm:$0xff] %vm358_vm0, %v625_v49  ;;  %v708_v52 = vsel %vm705_vm3, %v707_v50, %v703_v51 }
 0x20e   : > { %v721_v54 = vmul.f32 %v1123_v53, %v708_v52 }
 0x210   : > { %v722_v55 = vadd.f32 %v721_v54, %v1717_v7 }
 0x212   : > { %vm723_vm4 = vcmp.gt.f32.partialorder %v722_v55, 0.9  ;;  %vm727_vm5 = vcmp.le.f32.partialorder %v722_v55, 0.9 }
 0x213   : > { %v1124_v22 = vsel %vm723_vm4, 1.0, %v1482_v33  ;;  %v1125_v24 = vsel %vm727_vm5, 1.0, %v1482_v33 }
 0x214   : > { %v730_v56 = vmul.f32 %v1125_v24, %v1123_v53  ;;  %v726_v57 = vmul.f32 %v1124_v22, %v1123_v53  ;;  %v752_v18 = vld [vmem:[#allocation3] sm:$0xff] }
 0x216   : > { %v731_v58 = vmul.f32 %v730_v56, %v708_v52  ;;  %v739_v59 = vadd.f32 %v730_v56, %v1711_v62 }
 0x218   : > { %v732_v60 = vadd.f32 %v731_v58, %v1717_v7  ;;  %v740_v61 = vadd.f32 %v739_v59, %v726_v57 }
 0x21a   : > { %v733_v63 = vsub.f32 1.0, %v732_v60 }
 0x21c   : > { %v734_v1 = vmul.f32 %v733_v63, %v726_v57 }
 0x21e   : > { %v1743_v5 = vadd.f32 %v734_v1, %v1714_v3 }
 0x220   : > { %v736_v6 = vmul.f32 %v1743_v5, %v726_v57 }
 0x222   : > { %v744_v8 = vadd.f32 %v736_v6, %v731_v58  ;;  %v737_v9 = vadd.f32 %v736_v6, %v732_v60 }
 0x224   : > { %747 = vperm.xlu1 %1253, %v744_v8   ;;  %vm848_vm8 = vcmp.lt.f32.partialorder %v737_v9, 1.0 }
 0x285   : > { %v803_v11 = vpop.f32.mrf.mxu2  ;;  %v816_v0 = vpop.f32.mrf.mxu3 }
 0x286   : > { %v820_v62 = vadd.f32 %v803_v11, %v1666_v35  ;;  %v1750_v7 = vadd.f32 %v1261_v10, %v816_v0 }
 0x288   : > { %v1144_v12 = vmul.f32 -1.442695, %v820_v62  ;;  %v845_v4 = vmax.f32 %v1750_v7, 0.0 }
 0x28a   : > { %1274 = vpow2.f32 %v1144_v12  ;;  %880 = vst.msk [vmem:[#allocation2] sm:$0xff] %vm358_vm0, %v845_v4 }
 0x28d   : > { %v805_v3 = vpop.f32.mrf.mxu2  ;;  %v818_v13 = vpop.f32.mrf.mxu3 }
 0x290   : > { %v1275_v14 = vpop.eup %1274 }
 0x291   : > { %v824_v15 = vadd.f32 1.0, %v1275_v14 }
 0x293   : > { %1276 = vrcp.f32 %v824_v15  ;;  %v836_v28 = vand.u32 2147483648, %v824_v15  ;;  %v834_v30 = vand.u32 2147483647, %v824_v15  ;;  %vm830_vm7 = vweird.f32 %v824_v15 }
 0x295   : > { %v837_v32 = vor.u32 1.1754944e-38, %v836_v28  ;;  %vm835_vm10 = vcmp.eq.f32.partialorder %v834_v30, 8.507059e+37 }
 0x296   : > { %v748_v2 = vpop.permute.xlu1 %747 }
 0x297   : > { %v753_v17 = vsub.f32 1.0, %v748_v2  ;;  %v751_v35 = vmul.f32 %v748_v2, %v715_v26  ;;  %v1145_v26 = vsel %vm848_vm8, 1.0, %v1482_v33 }
 0x299   : > { %v1277_v19 = vpop.eup %1276  ;;  %v754_v20 = vmul.f32 %v753_v17, %v752_v18 }
 0x29a   : > { %v826_v21 = vmul.f32 %v1277_v19, %v824_v15  ;;  %vm831_vm6 = vweird.f32 %v1277_v19 }
 0x29b   : > { %v755_v25 = vadd.f32 %v754_v20, %v751_v35  ;;  %vm832_vm9 = vmor %vm830_vm7, %vm831_vm6 }
 0x29c   : > { %v827_v27 = vsub.f32 1.0, %v826_v21 }
 0x29d   : > { %756 = vst.msk [vmem:[#allocation3] sm:$0xff] %vm358_vm0, %v755_v25 }
 0x29e   : > { %v828_v29 = vmul.f32 %v1277_v19, %v827_v27 }
 0x2a0   : > { %v829_v31 = vadd.f32 %v1277_v19, %v828_v29 }
 0x2a2   : > { %v833_v34 = vsel %vm832_vm9, %v1277_v19, %v829_v31 }
 0x2a3   : > { %v838_v23 = vsel %vm835_vm10, %v837_v32, %v833_v34 }
 0x2a4   : > { %v851_v36 = vmul.f32 %v1145_v26, %v838_v23  ;;  %v882_v52 = vld [vmem:[#allocation3] sm:$0xff] }
 0x2a6   : > { %v852_v37 = vadd.f32 %v851_v36, %v737_v9 }
 0x2a8   : > { %vm853_vm11 = vcmp.gt.f32.partialorder %v852_v37, 0.9  ;;  %vm857_vm12 = vcmp.le.f32.partialorder %v852_v37, 0.9 }
 0x2a9   : > { %v1146_v38 = vsel %vm853_vm11, 1.0, %v1482_v33  ;;  %v1147_v40 = vsel %vm857_vm12, 1.0, %v1482_v33 }
 0x2aa   : > { %v860_v42 = vmul.f32 %v1147_v40, %v1145_v26  ;;  %v856_v43 = vmul.f32 %v1146_v38, %v1145_v26 }
 0x2ac   : > { %v869_v44 = vadd.f32 %v860_v42, %v740_v61  ;;  %v861_v39 = vmul.f32 %v860_v42, %v838_v23 }
 0x2ae   : > { %v870_v41 = vadd.f32 %v869_v44, %v856_v43  ;;  %v862_v45 = vadd.f32 %v861_v39, %v737_v9 }
 0x2b0   : > { %894 = vrot.lane.b32.xlu2 %v870_v41, %s1483_s25  ;;  %v863_v46 = vsub.f32 1.0, %v862_v45  ;;  %s1412_s25 = sshra.s32 %s919_s19, 4  ;;  %s1413_s25 = int_to_ptr.hbm [resolvable:$true] %s1412_s25 }
 0x2b1   : > { %s1414_s5 = scalar_lea.hbm %s1413_s25, 8  ;;  %p1419_p10 = scmp.lt.s32.totalorder %s1413_s25, %s1813_s6 }
 0x2b2   : > { %v864_v16 = vmul.f32 %v863_v46, %v856_v43  ;;  %p1415_p4 = scmp.ne.s32.totalorder %s1413_s25, %s1414_s5  ;;  %p1420_p2 = scmp.lt.s32.totalorder %s1418_s8, %s1414_s5 }
 0x2b4   : > { %v865_v33 = vadd.f32 %v864_v16, %v1743_v5  ;;  %p1416_p8 = pnand %p1415_p4, %p1609_p3  ;;  %p1421_p11 = por %p1420_p2, %p1419_p10 }
 0x2b6   : > { %v866_v47 = vmul.f32 %v865_v33, %v856_v43  ;;  %891 = vst.msk [vmem:[%s355_s13] sm:$0xff] %vm890_vm13, %v865_v33  ;;  %p1417_p9 = pneg %p1416_p8 }
 0x2b8   : > { %v874_v48 = vadd.f32 %v866_v47, %v861_v39  ;;  %p1422_p12 = pnand %p1421_p11, %p1417_p9 }
 0x2ba   : > { %877 = vperm.xlu1 %1253, %v874_v48  }
 0x30a   : > { %v895_v49 = vpop.permute.xlu2 %894 }
 0x30b   : > { %898 = vst.msk [vmem:[%s355_s13] sm:$0xff] %vm897_vm14, %v895_v49 }
 0x32c   : > { %v878_v50 = vpop.permute.xlu1 %877 }
 0x32d   : > { %v883_v51 = vsub.f32 1.0, %v878_v50  ;;  %v881_v53 = vmul.f32 %v878_v50, %v845_v4 }
 0x32f   : > { %v884_v54 = vmul.f32 %v883_v51, %v882_v52 }
 0x331   : > { %v885_v55 = vadd.f32 %v884_v54, %v881_v53 }
 0x333   : > { %886 = vst.msk [vmem:[#allocation3] sm:$0xff] %vm358_vm0, %v885_v55 }
 0x33a   : > { %v887_v22 = vld [vmem:[#allocation3] sm:$0xff] }
 0x33b   : > { %888 = vst.msk [vmem:[%s345_s17] sm:$0xff] %vm358_vm0, %v887_v22 }
 0x33c   : > { %1425 = shalt.err (!%p1422_p12)
}
 0x33d   : > { %1182 = dma.vmem_to_hbm [thread:$0]  (%p1609_p3), %s917_s23, 128, %s919_s19, %s900_s24  }
 0x33e PF: > { %s933_s21 = sand.u32 1, %s1460_s26   ;;  %p1821_p13 = scmp.ge.s32.totalorder %s1472_s29, 2 }
 0x33f   : > { %s934_s30 = scalar_lea.sflag [#allocation11], %s933_s21 }
 0x340   : > { %p1199_p0 = pnand %p1821_p13, %p1562_p6 }
 0x342   : > { %p1200_p5 = pneg %p1199_p0 }
 0x344   : > { %1455 = dma.done.wait (%p1200_p5), %s934_s30, 128  }
 0x345   : > { %1457 = vsyncadd (%p1200_p5), %s934_s30, 4294967168  ;;  %p24_p7 = scmp.ge.s32.totalorder %s1596_s15, 4   ;;  %s1822_s26 = smov %s1464_s27 }
 0x346   : > { %s1823_s27 = smov %s1468_s28  ;;  %s1824_s28 = smov %s1605_s18 }
 0x347   : > { %s1825_s29 = smov %s1596_s15  ;;  %26 = sbr.rel (!%p24_p7) target bundleno = 9 (0x9), region = 116 }
 0x34c   :  { %947 = vsyncpa [#allocation10], 1 }
 0x34d   :  { %949 = vsyncpa [#allocation10 + $0x1], 1 }
 0x34e   :  { %950 = vsyncpa [#allocation13], 1 }
 0x34f   :  { %951 = vsyncpa [#allocation16], 1 }
 0x350   :  { %952 = vsyncpa [#allocation11], 1 }
 0x351   :  { %954 = vsyncpa [#allocation11 + $0x1], 1 }

</bundles_post_ra>
